<compile_context>
chip_gen: v5e
topology: v5e:2x2
jax: 0.10.0
libtpu: 0.0.40
codegen_flags: <defaults>
</compile_context>

<pallas_src>
import math
import jax
import jax.numpy as jnp
from jax.experimental import pallas as pl
from jax.experimental.pallas import tpu as pltpu

# ----------------------- tiny synthetic BERT config (small shapes) -----------------------
VOCAB       = 100
SEQ         = 8
HIDDEN      = 32          # "bert_output_dim"
NUM_HEADS   = 2
HEAD_DIM    = HIDDEN // NUM_HEADS
INTER       = 64          # FFN intermediate
NUM_LAYERS  = 2
OTHER_DIM   = 4           # other_features_dim
HEAD_HIDDEN = 16          # classifier hidden_size
NUM_CLASSES = 16
BATCH       = 2
BS          = BATCH * SEQ
LN_EPS      = 1e-12


def _ln(x, gamma, beta):
    mu = jnp.mean(x, axis=-1, keepdims=True)
    var = jnp.mean((x - mu) ** 2, axis=-1, keepdims=True)
    return (x - mu) * jax.lax.rsqrt(var + LN_EPS) * gamma + beta


# ------------------------------ fully fused forward kernel -------------------------------
def fused_bert_kernel(ids_ref, bias_ref, other_ref, pos_sel_ref, cls_sel_ref,
                      word_emb_ref, pos_emb_ref, type0_ref, emb_g_ref, emb_b_ref,
                      wqkv_ref, bqkv_ref, wo_ref, bo_ref, g1_ref, be1_ref,
                      w1_ref, b1_ref, w2_ref, b2_ref, g2_ref, be2_ref,
                      wp_ref, bp_ref, w1p_ref, w1o_ref, bh_ref, wout_ref, bout_ref,
                      out_ref):
    # ---------- embeddings (gather as one-hot MXU matmul) + embedding LayerNorm ----------
    ids = ids_ref[...]                                                   # (BS, 1) int32
    vocab_iota = jax.lax.broadcasted_iota(jnp.int32, (BS, VOCAB), 1)
    one_hot = (ids == vocab_iota).astype(jnp.float32)                    # (BS, VOCAB)
    x = jnp.dot(one_hot, word_emb_ref[...], preferred_element_type=jnp.float32)
    # positional embedding tiled over batches via constant selection matmul (no sublane tile)
    x = x + jnp.dot(pos_sel_ref[...], pos_emb_ref[...],
                    preferred_element_type=jnp.float32)
    # TODO(synk): token_type_ids assumed all-zero (segment-0 embedding only).
    x = x + type0_ref[...]
    x = _ln(x, emb_g_ref[...], emb_b_ref[...])                           # (BS, H) f32

    bias = bias_ref[...]                                                 # (BS, BS) additive attn bias
    scale = 1.0 / math.sqrt(HEAD_DIM)

    for l in range(NUM_LAYERS):                                          # static unrolled layer loop
        # fused QKV projection: one (BS,H) x (H,3H) bf16 MXU push, f32 accumulation
        qkv = jnp.dot(x.astype(jnp.bfloat16), wqkv_ref[l],
                      preferred_element_type=jnp.float32) + bqkv_ref[l]
        q = qkv[:, 0:HIDDEN]
        k = qkv[:, HIDDEN:2 * HIDDEN]
        v = qkv[:, 2 * HIDDEN:3 * HIDDEN]

        # per-head attention; Wo applied per head and accumulated (no lane-axis concat)
        attn_out = jnp.zeros((BS, HIDDEN), jnp.float32) + bo_ref[l]
        for h in range(NUM_HEADS):                                       # static head loop
            sl = slice(h * HEAD_DIM, (h + 1) * HEAD_DIM)
            q_h = q[:, sl]
            k_h = k[:, sl]
            v_h = v[:, sl]
            # contract last axis of both operands -> no explicit K transpose (no vxpose)
            scores = jax.lax.dot_general(
                q_h, k_h, dimension_numbers=(((1,), (1,)), ((), ())),
                preferred_element_type=jnp.float32) * scale + bias
            scores = scores - jnp.max(scores, axis=-1, keepdims=True)
            p = jnp.exp(scores)
            p = p * pl.reciprocal(jnp.sum(p, axis=-1, keepdims=True), approx=True)
            ctx_h = jnp.dot(p, v_h, preferred_element_type=jnp.float32)  # (BS, HD)
            attn_out = attn_out + jnp.dot(ctx_h.astype(jnp.bfloat16), wo_ref[l, h],
                                          preferred_element_type=jnp.float32)

        h1 = _ln(x + attn_out, g1_ref[l], be1_ref[l])                    # post-LN (BERT style)

        # FFN. TODO(synk): PyTorch/HF BERT uses exact-erf GELU; tanh approximation used here.
        ff = jnp.dot(h1.astype(jnp.bfloat16), w1_ref[l],
                     preferred_element_type=jnp.float32) + b1_ref[l]
        ff = jax.nn.gelu(ff, approximate=True)
        ff = jnp.dot(ff.astype(jnp.bfloat16), w2_ref[l],
                     preferred_element_type=jnp.float32) + b2_ref[l]

        x = _ln(h1 + ff, g2_ref[l], be2_ref[l])

    # BERT pooler on the [CLS] token of each batch element: constant selection-matrix matmul
    cls = jnp.dot(cls_sel_ref[...], x, preferred_element_type=jnp.float32)       # (B, H)
    pooled = jnp.tanh(jnp.dot(cls.astype(jnp.bfloat16), wp_ref[...],
                              preferred_element_type=jnp.float32) + bp_ref[...])

    other = other_ref[...]                                               # (B, OTHER_DIM)
    # torch.cat([pooled, other], dim=1) @ W1  ==  pooled @ W1[:Hb] + other @ W1[Hb:]
    hid = (jnp.dot(pooled, w1p_ref[...], preferred_element_type=jnp.float32)
           + jnp.dot(other, w1o_ref[...], preferred_element_type=jnp.float32)
           + bh_ref[...])
    hid = hid * jax.nn.sigmoid(hid)                                      # SiLU; Dropout = identity (eval)
    logits = jnp.dot(hid, wout_ref[...], preferred_element_type=jnp.float32) + bout_ref[...]
    out_ref[...] = logits.astype(out_ref.dtype)


def fused_forward_pallas(ids_flat, bias, other_features, pos_sel, cls_sel, params):
    st = params["stacked"]
    return pl.pallas_call(
        fused_bert_kernel,
        out_shape=jax.ShapeDtypeStruct((BATCH, NUM_CLASSES), jnp.float32),
        # no grid / BlockSpecs: single invocation, every (tiny) array whole-resident in VMEM.
        # 32 MiB scoped-VMEM limit is safe on v5e/v6e/v7x and leaves huge headroom here.
        compiler_params=pltpu.CompilerParams(vmem_limit_bytes=32 * 1024 * 1024),
    )(ids_flat, bias, other_features, pos_sel, cls_sel,
      params["word_emb"], params["pos_emb"], params["type0"],
      params["emb_gamma"], params["emb_beta"],
      st["wqkv"], st["bqkv"], st["wo"], st["bo"], st["g1"], st["be1"],
      st["w1"], st["b1"], st["w2"], st["b2"], st["g2"], st["be2"],
      params["wp"], params["bp"], params["w1_pool"], params["w1_other"],
      params["b1"], params["wout"], params["bout"])


# --------------------------------- parameter init (deterministic) ------------------------
def init_params(key):
    def nrm(k, shape, scale=0.02):
        return scale * jax.random.normal(k, shape, dtype=jnp.float32)

    keys = iter(jax.random.split(key, 64))
    params = {
        # embedding tables kept f32 (base-input precision); used in-kernel
        "word_emb": nrm(next(keys), (VOCAB, HIDDEN)),
        "pos_emb":  nrm(next(keys), (SEQ, HIDDEN)),
        "type0":    nrm(next(keys), (1, HIDDEN)),              # segment-0 embedding row
        "emb_gamma": jnp.ones((1, HIDDEN), jnp.float32),
        "emb_beta":  jnp.zeros((1, HIDDEN), jnp.float32),
        # pooler (weight bf16, bias f32)
        "wp": nrm(next(keys), (HIDDEN, HIDDEN)).astype(jnp.bfloat16),
        "bp": jnp.zeros((1, HIDDEN), jnp.float32),
        # classifier head (hidden_num = 1); tiny -> kept f32
        "w1_pool":  nrm(next(keys), (HIDDEN, HEAD_HIDDEN)),
        "w1_other": nrm(next(keys), (OTHER_DIM, HEAD_HIDDEN)),
        "b1":       jnp.zeros((1, HEAD_HIDDEN), jnp.float32),
        "wout":     nrm(next(keys), (HEAD_HIDDEN, NUM_CLASSES)),
        "bout":     jnp.zeros((1, NUM_CLASSES), jnp.float32),
    }
    # stacked encoder-layer weights: QKV fused along out-features; Wo split per head;
    # matmul weights bf16, biases / LN params f32.
    wqkv, bqkv, wo, bo, g1, be1, w1, b1, w2, b2, g2, be2 = ([] for _ in range(12))
    for _ in range(NUM_LAYERS):
        wq = nrm(next(keys), (HIDDEN, HIDDEN))
        wk = nrm(next(keys), (HIDDEN, HIDDEN))
        wv = nrm(next(keys), (HIDDEN, HIDDEN))
        wqkv.append(jnp.concatenate([wq, wk, wv], axis=1).astype(jnp.bfloat16))   # (H, 3H)
        bqkv.append(jnp.zeros((1, 3 * HIDDEN), jnp.float32))
        wo.append(nrm(next(keys), (HIDDEN, HIDDEN))
                  .reshape(NUM_HEADS, HEAD_DIM, HIDDEN).astype(jnp.bfloat16))     # (NH, HD, H)
        bo.append(jnp.zeros((1, HIDDEN), jnp.float32))
        g1.append(jnp.ones((1, HIDDEN), jnp.float32))
        be1.append(jnp.zeros((1, HIDDEN), jnp.float32))
        w1.append(nrm(next(keys), (HIDDEN, INTER)).astype(jnp.bfloat16))
        b1.append(jnp.zeros((1, INTER), jnp.float32))
        w2.append(nrm(next(keys), (INTER, HIDDEN)).astype(jnp.bfloat16))
        b2.append(jnp.zeros((1, HIDDEN), jnp.float32))
        g2.append(jnp.ones((1, HIDDEN), jnp.float32))
        be2.append(jnp.zeros((1, HIDDEN), jnp.float32))
    params["stacked"] = {
        "wqkv": jnp.stack(wqkv), "bqkv": jnp.stack(bqkv),
        "wo": jnp.stack(wo), "bo": jnp.stack(bo),
        "g1": jnp.stack(g1), "be1": jnp.stack(be1),
        "w1": jnp.stack(w1), "b1": jnp.stack(b1),
        "w2": jnp.stack(w2), "b2": jnp.stack(b2),
        "g2": jnp.stack(g2), "be2": jnp.stack(be2),
    }
    return params


# --------------------------------- full forward (BertClassifier.forward) -----------------
@jax.jit
def bert_classifier_forward(params, input_ids, attention_mask, other_features):
    B, S = input_ids.shape

    ids_flat = input_ids.reshape(B * S, 1).astype(jnp.int32)             # rows = b*S + s

    # Precomputed additive attention bias: block-diagonal over batches + key padding.
    mask_flat = attention_mask.reshape(1, B * S).astype(jnp.float32)
    q_bid = jnp.arange(B * S, dtype=jnp.int32)[:, None] // S
    k_bid = jnp.arange(B * S, dtype=jnp.int32)[None, :] // S
    allowed = (q_bid == k_bid) & (mask_flat > 0.5)
    bias = jnp.where(allowed, 0.0, -1e9).astype(jnp.float32)             # (BS, BS)

    # Constant selection matrices (constant-folded by XLA; tiny VMEM inputs to the kernel).
    pos_sel = (jnp.arange(B * S, dtype=jnp.int32)[:, None] % S
               == jnp.arange(S, dtype=jnp.int32)[None, :]).astype(jnp.float32)   # (BS, S)
    cls_sel = (jnp.arange(B, dtype=jnp.int32)[:, None] * S
               == jnp.arange(B * S, dtype=jnp.int32)[None, :]).astype(jnp.float32)  # (B, BS)

    return fused_forward_pallas(ids_flat, bias,
                                other_features.astype(jnp.float32),
                                pos_sel, cls_sel, params)


if __name__ == "__main__":
    key = jax.random.PRNGKey(0)
    kp, kid, kof = jax.random.split(key, 3)

    params = init_params(kp)
    input_ids = jax.random.randint(kid, (BATCH, SEQ), 0, VOCAB, dtype=jnp.int32)
    attention_mask = jnp.ones((BATCH, SEQ), dtype=jnp.int32)
    attention_mask = attention_mask.at[1, SEQ - 2:].set(0)               # some padding in batch 1
    other_features = jax.random.normal(kof, (BATCH, OTHER_DIM), dtype=jnp.float32)

    logits = bert_classifier_forward(params, input_ids, attention_mask, other_features)
    jax.block_until_ready(logits)
    assert logits.shape == (BATCH, NUM_CLASSES)
    print("KERNEL_OK")
</pallas_src>

<mosaic_0001>
module attributes {stable_mosaic.version = 11 : i64} {
  func.func @fused_bert_kernel(%arg0: memref<16x1xi32, #tpu.memory_space<vmem>>, %arg1: memref<16x16xf32, #tpu.memory_space<vmem>>, %arg2: memref<2x4xf32, #tpu.memory_space<vmem>>, %arg3: memref<16x8xf32, #tpu.memory_space<vmem>>, %arg4: memref<2x16xf32, #tpu.memory_space<vmem>>, %arg5: memref<100x32xf32, #tpu.memory_space<vmem>>, %arg6: memref<8x32xf32, #tpu.memory_space<vmem>>, %arg7: memref<1x32xf32, #tpu.memory_space<vmem>>, %arg8: memref<1x32xf32, #tpu.memory_space<vmem>>, %arg9: memref<1x32xf32, #tpu.memory_space<vmem>>, %arg10: memref<2x32x96xbf16, #tpu.memory_space<vmem>>, %arg11: memref<2x1x96xf32, #tpu.memory_space<vmem>>, %arg12: memref<2x2x16x32xbf16, #tpu.memory_space<vmem>>, %arg13: memref<2x1x32xf32, #tpu.memory_space<vmem>>, %arg14: memref<2x1x32xf32, #tpu.memory_space<vmem>>, %arg15: memref<2x1x32xf32, #tpu.memory_space<vmem>>, %arg16: memref<2x32x64xbf16, #tpu.memory_space<vmem>>, %arg17: memref<2x1x64xf32, #tpu.memory_space<vmem>>, %arg18: memref<2x64x32xbf16, #tpu.memory_space<vmem>>, %arg19: memref<2x1x32xf32, #tpu.memory_space<vmem>>, %arg20: memref<2x1x32xf32, #tpu.memory_space<vmem>>, %arg21: memref<2x1x32xf32, #tpu.memory_space<vmem>>, %arg22: memref<32x32xbf16, #tpu.memory_space<vmem>>, %arg23: memref<1x32xf32, #tpu.memory_space<vmem>>, %arg24: memref<32x16xf32, #tpu.memory_space<vmem>>, %arg25: memref<4x16xf32, #tpu.memory_space<vmem>>, %arg26: memref<1x16xf32, #tpu.memory_space<vmem>>, %arg27: memref<16x16xf32, #tpu.memory_space<vmem>>, %arg28: memref<1x16xf32, #tpu.memory_space<vmem>>, %arg29: memref<2x16xf32, #tpu.memory_space<vmem>>) attributes {dimension_semantics = [], scalar_prefetch = 0 : i64, scratch_operands = 0 : i64, tpu.core_type = #tpu.core_type<tc>} {
    %c0 = arith.constant 0 : index
    %c0_0 = arith.constant 0 : index
    %0 = vector.load %arg0[%c0, %c0_0] : memref<16x1xi32, #tpu.memory_space<vmem>>, vector<16x1xi32>
    %1 = tpu.iota {dimensions = array<i32: 1>} : vector<16x100xi32>
    %2 = vector.broadcast %0 : vector<16x1xi32> to vector<16x100xi32>
    %3 = arith.cmpi eq, %2, %1 : vector<16x100xi32>
    %4 = arith.extui %3 : vector<16x100xi1> to vector<16x100xi32>
    %5 = arith.sitofp %4 : vector<16x100xi32> to vector<16x100xf32>
    %c0_1 = arith.constant 0 : index
    %c0_2 = arith.constant 0 : index
    %6 = vector.load %arg5[%c0_1, %c0_2] : memref<100x32xf32, #tpu.memory_space<vmem>>, vector<100x32xf32>
    %cst = arith.constant dense<0.000000e+00> : vector<16x32xf32>
    %7 = tpu.matmul %5, %6, %cst {dimension_numbers = #tpu.dot_dimension_numbers<[1], [0], [0], [1], [0, 0, 1, 1], [], []>} : vector<16x100xf32>, vector<100x32xf32>, vector<16x32xf32> -> vector<16x32xf32>
    %c0_3 = arith.constant 0 : index
    %c0_4 = arith.constant 0 : index
    %8 = vector.load %arg3[%c0_3, %c0_4] : memref<16x8xf32, #tpu.memory_space<vmem>>, vector<16x8xf32>
    %c0_5 = arith.constant 0 : index
    %c0_6 = arith.constant 0 : index
    %9 = vector.load %arg6[%c0_5, %c0_6] : memref<8x32xf32, #tpu.memory_space<vmem>>, vector<8x32xf32>
    %cst_7 = arith.constant dense<0.000000e+00> : vector<16x32xf32>
    %10 = tpu.matmul %8, %9, %cst_7 {dimension_numbers = #tpu.dot_dimension_numbers<[1], [0], [0], [1], [0, 0, 1, 1], [], []>} : vector<16x8xf32>, vector<8x32xf32>, vector<16x32xf32> -> vector<16x32xf32>
    %11 = arith.addf %7, %10 : vector<16x32xf32>
    %c0_8 = arith.constant 0 : index
    %c0_9 = arith.constant 0 : index
    %12 = vector.load %arg7[%c0_8, %c0_9] : memref<1x32xf32, #tpu.memory_space<vmem>>, vector<1x32xf32>
    %13 = vector.broadcast %12 : vector<1x32xf32> to vector<16x32xf32>
    %14 = arith.addf %11, %13 : vector<16x32xf32>
    %c0_10 = arith.constant 0 : index
    %c0_11 = arith.constant 0 : index
    %15 = vector.load %arg8[%c0_10, %c0_11] : memref<1x32xf32, #tpu.memory_space<vmem>>, vector<1x32xf32>
    %c0_12 = arith.constant 0 : index
    %c0_13 = arith.constant 0 : index
    %16 = vector.load %arg9[%c0_12, %c0_13] : memref<1x32xf32, #tpu.memory_space<vmem>>, vector<1x32xf32>
    %cst_14 = arith.constant dense<0.000000e+00> : vector<16xf32>
    %17 = vector.multi_reduction <add>, %14, %cst_14 [1] : vector<16x32xf32> to vector<16xf32>
    %18 = vector.shape_cast %17 : vector<16xf32> to vector<16x1xf32>
    %cst_15 = arith.constant 3.200000e+01 : f32
    %19 = vector.broadcast %cst_15 : f32 to vector<16x1xf32>
    %20 = arith.divf %18, %19 : vector<16x1xf32>
    %21 = vector.broadcast %20 : vector<16x1xf32> to vector<16x32xf32>
    %22 = arith.subf %14, %21 : vector<16x32xf32>
    %23 = arith.mulf %22, %22 : vector<16x32xf32>
    %cst_16 = arith.constant dense<0.000000e+00> : vector<16xf32>
    %24 = vector.multi_reduction <add>, %23, %cst_16 [1] : vector<16x32xf32> to vector<16xf32>
    %25 = vector.shape_cast %24 : vector<16xf32> to vector<16x1xf32>
    %cst_17 = arith.constant 3.200000e+01 : f32
    %26 = vector.broadcast %cst_17 : f32 to vector<16x1xf32>
    %27 = arith.divf %25, %26 : vector<16x1xf32>
    %28 = vector.broadcast %20 : vector<16x1xf32> to vector<16x32xf32>
    %29 = arith.subf %14, %28 : vector<16x32xf32>
    %cst_18 = arith.constant 9.99999996E-13 : f32
    %30 = vector.broadcast %cst_18 : f32 to vector<16x1xf32>
    %31 = arith.addf %27, %30 : vector<16x1xf32>
    %32 = math.rsqrt %31 : vector<16x1xf32>
    %33 = vector.broadcast %32 : vector<16x1xf32> to vector<16x32xf32>
    %34 = arith.mulf %29, %33 : vector<16x32xf32>
    %35 = vector.broadcast %15 : vector<1x32xf32> to vector<16x32xf32>
    %36 = arith.mulf %34, %35 : vector<16x32xf32>
    %37 = vector.broadcast %16 : vector<1x32xf32> to vector<16x32xf32>
    %38 = arith.addf %36, %37 : vector<16x32xf32>
    %c0_19 = arith.constant 0 : index
    %c0_20 = arith.constant 0 : index
    %39 = vector.load %arg1[%c0_19, %c0_20] : memref<16x16xf32, #tpu.memory_space<vmem>>, vector<16x16xf32>
    %40 = arith.truncf %38 : vector<16x32xf32> to vector<16x32xbf16>
    %c0_21 = arith.constant 0 : index
    %c0_22 = arith.constant 0 : index
    %c0_23 = arith.constant 0 : index
    %41 = vector.load %arg10[%c0_21, %c0_22, %c0_23] : memref<2x32x96xbf16, #tpu.memory_space<vmem>>, vector<1x32x96xbf16>
    %42 = vector.shape_cast %41 : vector<1x32x96xbf16> to vector<32x96xbf16>
    %cst_24 = arith.constant dense<0.000000e+00> : vector<16x96xf32>
    %43 = tpu.matmul %40, %42, %cst_24 {dimension_numbers = #tpu.dot_dimension_numbers<[1], [0], [0], [1], [0, 0, 1, 1], [], []>} : vector<16x32xbf16>, vector<32x96xbf16>, vector<16x96xf32> -> vector<16x96xf32>
    %c0_25 = arith.constant 0 : index
    %c0_26 = arith.constant 0 : index
    %c0_27 = arith.constant 0 : index
    %44 = vector.load %arg11[%c0_25, %c0_26, %c0_27] : memref<2x1x96xf32, #tpu.memory_space<vmem>>, vector<1x1x96xf32>
    %45 = vector.shape_cast %44 : vector<1x1x96xf32> to vector<1x96xf32>
    %46 = vector.broadcast %45 : vector<1x96xf32> to vector<16x96xf32>
    %47 = arith.addf %43, %46 : vector<16x96xf32>
    %48 = vector.extract_strided_slice %47 {offsets = [0, 0], sizes = [16, 32], strides = [1, 1]} : vector<16x96xf32> to vector<16x32xf32>
    %49 = vector.extract_strided_slice %47 {offsets = [0, 32], sizes = [16, 32], strides = [1, 1]} : vector<16x96xf32> to vector<16x32xf32>
    %50 = vector.extract_strided_slice %47 {offsets = [0, 64], sizes = [16, 32], strides = [1, 1]} : vector<16x96xf32> to vector<16x32xf32>
    %cst_28 = arith.constant 0.000000e+00 : f32
    %51 = vector.broadcast %cst_28 : f32 to vector<16x32xf32>
    %c0_29 = arith.constant 0 : index
    %c0_30 = arith.constant 0 : index
    %c0_31 = arith.constant 0 : index
    %52 = vector.load %arg13[%c0_29, %c0_30, %c0_31] : memref<2x1x32xf32, #tpu.memory_space<vmem>>, vector<1x1x32xf32>
    %53 = vector.shape_cast %52 : vector<1x1x32xf32> to vector<1x32xf32>
    %54 = vector.broadcast %53 : vector<1x32xf32> to vector<16x32xf32>
    %55 = arith.addf %51, %54 : vector<16x32xf32>
    %56 = vector.extract_strided_slice %48 {offsets = [0, 0], sizes = [16, 16], strides = [1, 1]} : vector<16x32xf32> to vector<16x16xf32>
    %57 = vector.extract_strided_slice %49 {offsets = [0, 0], sizes = [16, 16], strides = [1, 1]} : vector<16x32xf32> to vector<16x16xf32>
    %58 = vector.extract_strided_slice %50 {offsets = [0, 0], sizes = [16, 16], strides = [1, 1]} : vector<16x32xf32> to vector<16x16xf32>
    %cst_32 = arith.constant dense<0.000000e+00> : vector<16x16xf32>
    %59 = tpu.matmul %56, %57, %cst_32 {dimension_numbers = #tpu.dot_dimension_numbers<[1], [1], [0], [0], [0, 0, 1, 0], [], []>} : vector<16x16xf32>, vector<16x16xf32>, vector<16x16xf32> -> vector<16x16xf32>
    %cst_33 = arith.constant 2.500000e-01 : f32
    %60 = vector.broadcast %cst_33 : f32 to vector<16x16xf32>
    %61 = arith.mulf %59, %60 : vector<16x16xf32>
    %62 = arith.addf %61, %39 : vector<16x16xf32>
    %cst_34 = arith.constant dense<0xFF800000> : vector<16xf32>
    %63 = vector.multi_reduction <maximumf>, %62, %cst_34 [1] : vector<16x16xf32> to vector<16xf32>
    %64 = vector.shape_cast %63 : vector<16xf32> to vector<16x1xf32>
    %65 = vector.broadcast %64 : vector<16x1xf32> to vector<16x16xf32>
    %66 = arith.subf %62, %65 : vector<16x16xf32>
    %67 = math.exp %66 : vector<16x16xf32>
    %cst_35 = arith.constant dense<0.000000e+00> : vector<16xf32>
    %68 = vector.multi_reduction <add>, %67, %cst_35 [1] : vector<16x16xf32> to vector<16xf32>
    %69 = vector.shape_cast %68 : vector<16xf32> to vector<16x1xf32>
    %70 = tpu.reciprocal %69 {approx = true} : vector<16x1xf32> -> vector<16x1xf32>
    %71 = vector.broadcast %70 : vector<16x1xf32> to vector<16x16xf32>
    %72 = arith.mulf %67, %71 : vector<16x16xf32>
    %cst_36 = arith.constant dense<0.000000e+00> : vector<16x16xf32>
    %73 = tpu.matmul %72, %58, %cst_36 {dimension_numbers = #tpu.dot_dimension_numbers<[1], [0], [0], [1], [0, 0, 1, 1], [], []>} : vector<16x16xf32>, vector<16x16xf32>, vector<16x16xf32> -> vector<16x16xf32>
    %74 = arith.truncf %73 : vector<16x16xf32> to vector<16x16xbf16>
    %c0_37 = arith.constant 0 : index
    %c0_38 = arith.constant 0 : index
    %c0_39 = arith.constant 0 : index
    %c0_40 = arith.constant 0 : index
    %75 = vector.load %arg12[%c0_37, %c0_38, %c0_39, %c0_40] : memref<2x2x16x32xbf16, #tpu.memory_space<vmem>>, vector<1x1x16x32xbf16>
    %76 = vector.shape_cast %75 : vector<1x1x16x32xbf16> to vector<16x32xbf16>
    %cst_41 = arith.constant dense<0.000000e+00> : vector<16x32xf32>
    %77 = tpu.matmul %74, %76, %cst_41 {dimension_numbers = #tpu.dot_dimension_numbers<[1], [0], [0], [1], [0, 0, 1, 1], [], []>} : vector<16x16xbf16>, vector<16x32xbf16>, vector<16x32xf32> -> vector<16x32xf32>
    %78 = arith.addf %55, %77 : vector<16x32xf32>
    %79 = vector.extract_strided_slice %48 {offsets = [0, 16], sizes = [16, 16], strides = [1, 1]} : vector<16x32xf32> to vector<16x16xf32>
    %80 = vector.extract_strided_slice %49 {offsets = [0, 16], sizes = [16, 16], strides = [1, 1]} : vector<16x32xf32> to vector<16x16xf32>
    %81 = vector.extract_strided_slice %50 {offsets = [0, 16], sizes = [16, 16], strides = [1, 1]} : vector<16x32xf32> to vector<16x16xf32>
    %cst_42 = arith.constant dense<0.000000e+00> : vector<16x16xf32>
    %82 = tpu.matmul %79, %80, %cst_42 {dimension_numbers = #tpu.dot_dimension_numbers<[1], [1], [0], [0], [0, 0, 1, 0], [], []>} : vector<16x16xf32>, vector<16x16xf32>, vector<16x16xf32> -> vector<16x16xf32>
    %cst_43 = arith.constant 2.500000e-01 : f32
    %83 = vector.broadcast %cst_43 : f32 to vector<16x16xf32>
    %84 = arith.mulf %82, %83 : vector<16x16xf32>
    %85 = arith.addf %84, %39 : vector<16x16xf32>
    %cst_44 = arith.constant dense<0xFF800000> : vector<16xf32>
    %86 = vector.multi_reduction <maximumf>, %85, %cst_44 [1] : vector<16x16xf32> to vector<16xf32>
    %87 = vector.shape_cast %86 : vector<16xf32> to vector<16x1xf32>
    %88 = vector.broadcast %87 : vector<16x1xf32> to vector<16x16xf32>
    %89 = arith.subf %85, %88 : vector<16x16xf32>
    %90 = math.exp %89 : vector<16x16xf32>
    %cst_45 = arith.constant dense<0.000000e+00> : vector<16xf32>
    %91 = vector.multi_reduction <add>, %90, %cst_45 [1] : vector<16x16xf32> to vector<16xf32>
    %92 = vector.shape_cast %91 : vector<16xf32> to vector<16x1xf32>
    %93 = tpu.reciprocal %92 {approx = true} : vector<16x1xf32> -> vector<16x1xf32>
    %94 = vector.broadcast %93 : vector<16x1xf32> to vector<16x16xf32>
    %95 = arith.mulf %90, %94 : vector<16x16xf32>
    %cst_46 = arith.constant dense<0.000000e+00> : vector<16x16xf32>
    %96 = tpu.matmul %95, %81, %cst_46 {dimension_numbers = #tpu.dot_dimension_numbers<[1], [0], [0], [1], [0, 0, 1, 1], [], []>} : vector<16x16xf32>, vector<16x16xf32>, vector<16x16xf32> -> vector<16x16xf32>
    %97 = arith.truncf %96 : vector<16x16xf32> to vector<16x16xbf16>
    %c0_47 = arith.constant 0 : index
    %c1 = arith.constant 1 : index
    %c0_48 = arith.constant 0 : index
    %c0_49 = arith.constant 0 : index
    %98 = vector.load %arg12[%c0_47, %c1, %c0_48, %c0_49] : memref<2x2x16x32xbf16, #tpu.memory_space<vmem>>, vector<1x1x16x32xbf16>
    %99 = vector.shape_cast %98 : vector<1x1x16x32xbf16> to vector<16x32xbf16>
    %cst_50 = arith.constant dense<0.000000e+00> : vector<16x32xf32>
    %100 = tpu.matmul %97, %99, %cst_50 {dimension_numbers = #tpu.dot_dimension_numbers<[1], [0], [0], [1], [0, 0, 1, 1], [], []>} : vector<16x16xbf16>, vector<16x32xbf16>, vector<16x32xf32> -> vector<16x32xf32>
    %101 = arith.addf %78, %100 : vector<16x32xf32>
    %102 = arith.addf %38, %101 : vector<16x32xf32>
    %c0_51 = arith.constant 0 : index
    %c0_52 = arith.constant 0 : index
    %c0_53 = arith.constant 0 : index
    %103 = vector.load %arg14[%c0_51, %c0_52, %c0_53] : memref<2x1x32xf32, #tpu.memory_space<vmem>>, vector<1x1x32xf32>
    %104 = vector.shape_cast %103 : vector<1x1x32xf32> to vector<1x32xf32>
    %c0_54 = arith.constant 0 : index
    %c0_55 = arith.constant 0 : index
    %c0_56 = arith.constant 0 : index
    %105 = vector.load %arg15[%c0_54, %c0_55, %c0_56] : memref<2x1x32xf32, #tpu.memory_space<vmem>>, vector<1x1x32xf32>
    %106 = vector.shape_cast %105 : vector<1x1x32xf32> to vector<1x32xf32>
    %cst_57 = arith.constant dense<0.000000e+00> : vector<16xf32>
    %107 = vector.multi_reduction <add>, %102, %cst_57 [1] : vector<16x32xf32> to vector<16xf32>
    %108 = vector.shape_cast %107 : vector<16xf32> to vector<16x1xf32>
    %cst_58 = arith.constant 3.200000e+01 : f32
    %109 = vector.broadcast %cst_58 : f32 to vector<16x1xf32>
    %110 = arith.divf %108, %109 : vector<16x1xf32>
    %111 = vector.broadcast %110 : vector<16x1xf32> to vector<16x32xf32>
    %112 = arith.subf %102, %111 : vector<16x32xf32>
    %113 = arith.mulf %112, %112 : vector<16x32xf32>
    %cst_59 = arith.constant dense<0.000000e+00> : vector<16xf32>
    %114 = vector.multi_reduction <add>, %113, %cst_59 [1] : vector<16x32xf32> to vector<16xf32>
    %115 = vector.shape_cast %114 : vector<16xf32> to vector<16x1xf32>
    %cst_60 = arith.constant 3.200000e+01 : f32
    %116 = vector.broadcast %cst_60 : f32 to vector<16x1xf32>
    %117 = arith.divf %115, %116 : vector<16x1xf32>
    %118 = vector.broadcast %110 : vector<16x1xf32> to vector<16x32xf32>
    %119 = arith.subf %102, %118 : vector<16x32xf32>
    %cst_61 = arith.constant 9.99999996E-13 : f32
    %120 = vector.broadcast %cst_61 : f32 to vector<16x1xf32>
    %121 = arith.addf %117, %120 : vector<16x1xf32>
    %122 = math.rsqrt %121 : vector<16x1xf32>
    %123 = vector.broadcast %122 : vector<16x1xf32> to vector<16x32xf32>
    %124 = arith.mulf %119, %123 : vector<16x32xf32>
    %125 = vector.broadcast %104 : vector<1x32xf32> to vector<16x32xf32>
    %126 = arith.mulf %124, %125 : vector<16x32xf32>
    %127 = vector.broadcast %106 : vector<1x32xf32> to vector<16x32xf32>
    %128 = arith.addf %126, %127 : vector<16x32xf32>
    %129 = arith.truncf %128 : vector<16x32xf32> to vector<16x32xbf16>
    %c0_62 = arith.constant 0 : index
    %c0_63 = arith.constant 0 : index
    %c0_64 = arith.constant 0 : index
    %130 = vector.load %arg16[%c0_62, %c0_63, %c0_64] : memref<2x32x64xbf16, #tpu.memory_space<vmem>>, vector<1x32x64xbf16>
    %131 = vector.shape_cast %130 : vector<1x32x64xbf16> to vector<32x64xbf16>
    %cst_65 = arith.constant dense<0.000000e+00> : vector<16x64xf32>
    %132 = tpu.matmul %129, %131, %cst_65 {dimension_numbers = #tpu.dot_dimension_numbers<[1], [0], [0], [1], [0, 0, 1, 1], [], []>} : vector<16x32xbf16>, vector<32x64xbf16>, vector<16x64xf32> -> vector<16x64xf32>
    %c0_66 = arith.constant 0 : index
    %c0_67 = arith.constant 0 : index
    %c0_68 = arith.constant 0 : index
    %133 = vector.load %arg17[%c0_66, %c0_67, %c0_68] : memref<2x1x64xf32, #tpu.memory_space<vmem>>, vector<1x1x64xf32>
    %134 = vector.shape_cast %133 : vector<1x1x64xf32> to vector<1x64xf32>
    %135 = vector.broadcast %134 : vector<1x64xf32> to vector<16x64xf32>
    %136 = arith.addf %132, %135 : vector<16x64xf32>
    %137 = arith.mulf %136, %136 : vector<16x64xf32>
    %138 = arith.mulf %136, %137 : vector<16x64xf32>
    %cst_69 = arith.constant 4.471500e-02 : f32
    %139 = vector.broadcast %cst_69 : f32 to vector<16x64xf32>
    %140 = arith.mulf %139, %138 : vector<16x64xf32>
    %141 = arith.addf %136, %140 : vector<16x64xf32>
    %cst_70 = arith.constant 0.797884583 : f32
    %142 = vector.broadcast %cst_70 : f32 to vector<16x64xf32>
    %143 = arith.mulf %142, %141 : vector<16x64xf32>
    %144 = math.tanh %143 : vector<16x64xf32>
    %cst_71 = arith.constant 1.000000e+00 : f32
    %145 = vector.broadcast %cst_71 : f32 to vector<16x64xf32>
    %146 = arith.addf %145, %144 : vector<16x64xf32>
    %cst_72 = arith.constant 5.000000e-01 : f32
    %147 = vector.broadcast %cst_72 : f32 to vector<16x64xf32>
    %148 = arith.mulf %147, %146 : vector<16x64xf32>
    %149 = arith.mulf %136, %148 : vector<16x64xf32>
    %150 = arith.truncf %149 : vector<16x64xf32> to vector<16x64xbf16>
    %c0_73 = arith.constant 0 : index
    %c0_74 = arith.constant 0 : index
    %c0_75 = arith.constant 0 : index
    %151 = vector.load %arg18[%c0_73, %c0_74, %c0_75] : memref<2x64x32xbf16, #tpu.memory_space<vmem>>, vector<1x64x32xbf16>
    %152 = vector.shape_cast %151 : vector<1x64x32xbf16> to vector<64x32xbf16>
    %cst_76 = arith.constant dense<0.000000e+00> : vector<16x32xf32>
    %153 = tpu.matmul %150, %152, %cst_76 {dimension_numbers = #tpu.dot_dimension_numbers<[1], [0], [0], [1], [0, 0, 1, 1], [], []>} : vector<16x64xbf16>, vector<64x32xbf16>, vector<16x32xf32> -> vector<16x32xf32>
    %c0_77 = arith.constant 0 : index
    %c0_78 = arith.constant 0 : index
    %c0_79 = arith.constant 0 : index
    %154 = vector.load %arg19[%c0_77, %c0_78, %c0_79] : memref<2x1x32xf32, #tpu.memory_space<vmem>>, vector<1x1x32xf32>
    %155 = vector.shape_cast %154 : vector<1x1x32xf32> to vector<1x32xf32>
    %156 = vector.broadcast %155 : vector<1x32xf32> to vector<16x32xf32>
    %157 = arith.addf %153, %156 : vector<16x32xf32>
    %158 = arith.addf %128, %157 : vector<16x32xf32>
    %c0_80 = arith.constant 0 : index
    %c0_81 = arith.constant 0 : index
    %c0_82 = arith.constant 0 : index
    %159 = vector.load %arg20[%c0_80, %c0_81, %c0_82] : memref<2x1x32xf32, #tpu.memory_space<vmem>>, vector<1x1x32xf32>
    %160 = vector.shape_cast %159 : vector<1x1x32xf32> to vector<1x32xf32>
    %c0_83 = arith.constant 0 : index
    %c0_84 = arith.constant 0 : index
    %c0_85 = arith.constant 0 : index
    %161 = vector.load %arg21[%c0_83, %c0_84, %c0_85] : memref<2x1x32xf32, #tpu.memory_space<vmem>>, vector<1x1x32xf32>
    %162 = vector.shape_cast %161 : vector<1x1x32xf32> to vector<1x32xf32>
    %cst_86 = arith.constant dense<0.000000e+00> : vector<16xf32>
    %163 = vector.multi_reduction <add>, %158, %cst_86 [1] : vector<16x32xf32> to vector<16xf32>
    %164 = vector.shape_cast %163 : vector<16xf32> to vector<16x1xf32>
    %cst_87 = arith.constant 3.200000e+01 : f32
    %165 = vector.broadcast %cst_87 : f32 to vector<16x1xf32>
    %166 = arith.divf %164, %165 : vector<16x1xf32>
    %167 = vector.broadcast %166 : vector<16x1xf32> to vector<16x32xf32>
    %168 = arith.subf %158, %167 : vector<16x32xf32>
    %169 = arith.mulf %168, %168 : vector<16x32xf32>
    %cst_88 = arith.constant dense<0.000000e+00> : vector<16xf32>
    %170 = vector.multi_reduction <add>, %169, %cst_88 [1] : vector<16x32xf32> to vector<16xf32>
    %171 = vector.shape_cast %170 : vector<16xf32> to vector<16x1xf32>
    %cst_89 = arith.constant 3.200000e+01 : f32
    %172 = vector.broadcast %cst_89 : f32 to vector<16x1xf32>
    %173 = arith.divf %171, %172 : vector<16x1xf32>
    %174 = vector.broadcast %166 : vector<16x1xf32> to vector<16x32xf32>
    %175 = arith.subf %158, %174 : vector<16x32xf32>
    %cst_90 = arith.constant 9.99999996E-13 : f32
    %176 = vector.broadcast %cst_90 : f32 to vector<16x1xf32>
    %177 = arith.addf %173, %176 : vector<16x1xf32>
    %178 = math.rsqrt %177 : vector<16x1xf32>
    %179 = vector.broadcast %178 : vector<16x1xf32> to vector<16x32xf32>
    %180 = arith.mulf %175, %179 : vector<16x32xf32>
    %181 = vector.broadcast %160 : vector<1x32xf32> to vector<16x32xf32>
    %182 = arith.mulf %180, %181 : vector<16x32xf32>
    %183 = vector.broadcast %162 : vector<1x32xf32> to vector<16x32xf32>
    %184 = arith.addf %182, %183 : vector<16x32xf32>
    %185 = arith.truncf %184 : vector<16x32xf32> to vector<16x32xbf16>
    %c1_91 = arith.constant 1 : index
    %c0_92 = arith.constant 0 : index
    %c0_93 = arith.constant 0 : index
    %186 = vector.load %arg10[%c1_91, %c0_92, %c0_93] : memref<2x32x96xbf16, #tpu.memory_space<vmem>>, vector<1x32x96xbf16>
    %187 = vector.shape_cast %186 : vector<1x32x96xbf16> to vector<32x96xbf16>
    %cst_94 = arith.constant dense<0.000000e+00> : vector<16x96xf32>
    %188 = tpu.matmul %185, %187, %cst_94 {dimension_numbers = #tpu.dot_dimension_numbers<[1], [0], [0], [1], [0, 0, 1, 1], [], []>} : vector<16x32xbf16>, vector<32x96xbf16>, vector<16x96xf32> -> vector<16x96xf32>
    %c1_95 = arith.constant 1 : index
    %c0_96 = arith.constant 0 : index
    %c0_97 = arith.constant 0 : index
    %189 = vector.load %arg11[%c1_95, %c0_96, %c0_97] : memref<2x1x96xf32, #tpu.memory_space<vmem>>, vector<1x1x96xf32>
    %190 = vector.shape_cast %189 : vector<1x1x96xf32> to vector<1x96xf32>
    %191 = vector.broadcast %190 : vector<1x96xf32> to vector<16x96xf32>
    %192 = arith.addf %188, %191 : vector<16x96xf32>
    %193 = vector.extract_strided_slice %192 {offsets = [0, 0], sizes = [16, 32], strides = [1, 1]} : vector<16x96xf32> to vector<16x32xf32>
    %194 = vector.extract_strided_slice %192 {offsets = [0, 32], sizes = [16, 32], strides = [1, 1]} : vector<16x96xf32> to vector<16x32xf32>
    %195 = vector.extract_strided_slice %192 {offsets = [0, 64], sizes = [16, 32], strides = [1, 1]} : vector<16x96xf32> to vector<16x32xf32>
    %cst_98 = arith.constant 0.000000e+00 : f32
    %196 = vector.broadcast %cst_98 : f32 to vector<16x32xf32>
    %c1_99 = arith.constant 1 : index
    %c0_100 = arith.constant 0 : index
    %c0_101 = arith.constant 0 : index
    %197 = vector.load %arg13[%c1_99, %c0_100, %c0_101] : memref<2x1x32xf32, #tpu.memory_space<vmem>>, vector<1x1x32xf32>
    %198 = vector.shape_cast %197 : vector<1x1x32xf32> to vector<1x32xf32>
    %199 = vector.broadcast %198 : vector<1x32xf32> to vector<16x32xf32>
    %200 = arith.addf %196, %199 : vector<16x32xf32>
    %201 = vector.extract_strided_slice %193 {offsets = [0, 0], sizes = [16, 16], strides = [1, 1]} : vector<16x32xf32> to vector<16x16xf32>
    %202 = vector.extract_strided_slice %194 {offsets = [0, 0], sizes = [16, 16], strides = [1, 1]} : vector<16x32xf32> to vector<16x16xf32>
    %203 = vector.extract_strided_slice %195 {offsets = [0, 0], sizes = [16, 16], strides = [1, 1]} : vector<16x32xf32> to vector<16x16xf32>
    %cst_102 = arith.constant dense<0.000000e+00> : vector<16x16xf32>
    %204 = tpu.matmul %201, %202, %cst_102 {dimension_numbers = #tpu.dot_dimension_numbers<[1], [1], [0], [0], [0, 0, 1, 0], [], []>} : vector<16x16xf32>, vector<16x16xf32>, vector<16x16xf32> -> vector<16x16xf32>
    %cst_103 = arith.constant 2.500000e-01 : f32
    %205 = vector.broadcast %cst_103 : f32 to vector<16x16xf32>
    %206 = arith.mulf %204, %205 : vector<16x16xf32>
    %207 = arith.addf %206, %39 : vector<16x16xf32>
    %cst_104 = arith.constant dense<0xFF800000> : vector<16xf32>
    %208 = vector.multi_reduction <maximumf>, %207, %cst_104 [1] : vector<16x16xf32> to vector<16xf32>
    %209 = vector.shape_cast %208 : vector<16xf32> to vector<16x1xf32>
    %210 = vector.broadcast %209 : vector<16x1xf32> to vector<16x16xf32>
    %211 = arith.subf %207, %210 : vector<16x16xf32>
    %212 = math.exp %211 : vector<16x16xf32>
    %cst_105 = arith.constant dense<0.000000e+00> : vector<16xf32>
    %213 = vector.multi_reduction <add>, %212, %cst_105 [1] : vector<16x16xf32> to vector<16xf32>
    %214 = vector.shape_cast %213 : vector<16xf32> to vector<16x1xf32>
    %215 = tpu.reciprocal %214 {approx = true} : vector<16x1xf32> -> vector<16x1xf32>
    %216 = vector.broadcast %215 : vector<16x1xf32> to vector<16x16xf32>
    %217 = arith.mulf %212, %216 : vector<16x16xf32>
    %cst_106 = arith.constant dense<0.000000e+00> : vector<16x16xf32>
    %218 = tpu.matmul %217, %203, %cst_106 {dimension_numbers = #tpu.dot_dimension_numbers<[1], [0], [0], [1], [0, 0, 1, 1], [], []>} : vector<16x16xf32>, vector<16x16xf32>, vector<16x16xf32> -> vector<16x16xf32>
    %219 = arith.truncf %218 : vector<16x16xf32> to vector<16x16xbf16>
    %c1_107 = arith.constant 1 : index
    %c0_108 = arith.constant 0 : index
    %c0_109 = arith.constant 0 : index
    %c0_110 = arith.constant 0 : index
    %220 = vector.load %arg12[%c1_107, %c0_108, %c0_109, %c0_110] : memref<2x2x16x32xbf16, #tpu.memory_space<vmem>>, vector<1x1x16x32xbf16>
    %221 = vector.shape_cast %220 : vector<1x1x16x32xbf16> to vector<16x32xbf16>
    %cst_111 = arith.constant dense<0.000000e+00> : vector<16x32xf32>
    %222 = tpu.matmul %219, %221, %cst_111 {dimension_numbers = #tpu.dot_dimension_numbers<[1], [0], [0], [1], [0, 0, 1, 1], [], []>} : vector<16x16xbf16>, vector<16x32xbf16>, vector<16x32xf32> -> vector<16x32xf32>
    %223 = arith.addf %200, %222 : vector<16x32xf32>
    %224 = vector.extract_strided_slice %193 {offsets = [0, 16], sizes = [16, 16], strides = [1, 1]} : vector<16x32xf32> to vector<16x16xf32>
    %225 = vector.extract_strided_slice %194 {offsets = [0, 16], sizes = [16, 16], strides = [1, 1]} : vector<16x32xf32> to vector<16x16xf32>
    %226 = vector.extract_strided_slice %195 {offsets = [0, 16], sizes = [16, 16], strides = [1, 1]} : vector<16x32xf32> to vector<16x16xf32>
    %cst_112 = arith.constant dense<0.000000e+00> : vector<16x16xf32>
    %227 = tpu.matmul %224, %225, %cst_112 {dimension_numbers = #tpu.dot_dimension_numbers<[1], [1], [0], [0], [0, 0, 1, 0], [], []>} : vector<16x16xf32>, vector<16x16xf32>, vector<16x16xf32> -> vector<16x16xf32>
    %cst_113 = arith.constant 2.500000e-01 : f32
    %228 = vector.broadcast %cst_113 : f32 to vector<16x16xf32>
    %229 = arith.mulf %227, %228 : vector<16x16xf32>
    %230 = arith.addf %229, %39 : vector<16x16xf32>
    %cst_114 = arith.constant dense<0xFF800000> : vector<16xf32>
    %231 = vector.multi_reduction <maximumf>, %230, %cst_114 [1] : vector<16x16xf32> to vector<16xf32>
    %232 = vector.shape_cast %231 : vector<16xf32> to vector<16x1xf32>
    %233 = vector.broadcast %232 : vector<16x1xf32> to vector<16x16xf32>
    %234 = arith.subf %230, %233 : vector<16x16xf32>
    %235 = math.exp %234 : vector<16x16xf32>
    %cst_115 = arith.constant dense<0.000000e+00> : vector<16xf32>
    %236 = vector.multi_reduction <add>, %235, %cst_115 [1] : vector<16x16xf32> to vector<16xf32>
    %237 = vector.shape_cast %236 : vector<16xf32> to vector<16x1xf32>
    %238 = tpu.reciprocal %237 {approx = true} : vector<16x1xf32> -> vector<16x1xf32>
    %239 = vector.broadcast %238 : vector<16x1xf32> to vector<16x16xf32>
    %240 = arith.mulf %235, %239 : vector<16x16xf32>
    %cst_116 = arith.constant dense<0.000000e+00> : vector<16x16xf32>
    %241 = tpu.matmul %240, %226, %cst_116 {dimension_numbers = #tpu.dot_dimension_numbers<[1], [0], [0], [1], [0, 0, 1, 1], [], []>} : vector<16x16xf32>, vector<16x16xf32>, vector<16x16xf32> -> vector<16x16xf32>
    %242 = arith.truncf %241 : vector<16x16xf32> to vector<16x16xbf16>
    %c1_117 = arith.constant 1 : index
    %c1_118 = arith.constant 1 : index
    %c0_119 = arith.constant 0 : index
    %c0_120 = arith.constant 0 : index
    %243 = vector.load %arg12[%c1_117, %c1_118, %c0_119, %c0_120] : memref<2x2x16x32xbf16, #tpu.memory_space<vmem>>, vector<1x1x16x32xbf16>
    %244 = vector.shape_cast %243 : vector<1x1x16x32xbf16> to vector<16x32xbf16>
    %cst_121 = arith.constant dense<0.000000e+00> : vector<16x32xf32>
    %245 = tpu.matmul %242, %244, %cst_121 {dimension_numbers = #tpu.dot_dimension_numbers<[1], [0], [0], [1], [0, 0, 1, 1], [], []>} : vector<16x16xbf16>, vector<16x32xbf16>, vector<16x32xf32> -> vector<16x32xf32>
    %246 = arith.addf %223, %245 : vector<16x32xf32>
    %247 = arith.addf %184, %246 : vector<16x32xf32>
    %c1_122 = arith.constant 1 : index
    %c0_123 = arith.constant 0 : index
    %c0_124 = arith.constant 0 : index
    %248 = vector.load %arg14[%c1_122, %c0_123, %c0_124] : memref<2x1x32xf32, #tpu.memory_space<vmem>>, vector<1x1x32xf32>
    %249 = vector.shape_cast %248 : vector<1x1x32xf32> to vector<1x32xf32>
    %c1_125 = arith.constant 1 : index
    %c0_126 = arith.constant 0 : index
    %c0_127 = arith.constant 0 : index
    %250 = vector.load %arg15[%c1_125, %c0_126, %c0_127] : memref<2x1x32xf32, #tpu.memory_space<vmem>>, vector<1x1x32xf32>
    %251 = vector.shape_cast %250 : vector<1x1x32xf32> to vector<1x32xf32>
    %cst_128 = arith.constant dense<0.000000e+00> : vector<16xf32>
    %252 = vector.multi_reduction <add>, %247, %cst_128 [1] : vector<16x32xf32> to vector<16xf32>
    %253 = vector.shape_cast %252 : vector<16xf32> to vector<16x1xf32>
    %cst_129 = arith.constant 3.200000e+01 : f32
    %254 = vector.broadcast %cst_129 : f32 to vector<16x1xf32>
    %255 = arith.divf %253, %254 : vector<16x1xf32>
    %256 = vector.broadcast %255 : vector<16x1xf32> to vector<16x32xf32>
    %257 = arith.subf %247, %256 : vector<16x32xf32>
    %258 = arith.mulf %257, %257 : vector<16x32xf32>
    %cst_130 = arith.constant dense<0.000000e+00> : vector<16xf32>
    %259 = vector.multi_reduction <add>, %258, %cst_130 [1] : vector<16x32xf32> to vector<16xf32>
    %260 = vector.shape_cast %259 : vector<16xf32> to vector<16x1xf32>
    %cst_131 = arith.constant 3.200000e+01 : f32
    %261 = vector.broadcast %cst_131 : f32 to vector<16x1xf32>
    %262 = arith.divf %260, %261 : vector<16x1xf32>
    %263 = vector.broadcast %255 : vector<16x1xf32> to vector<16x32xf32>
    %264 = arith.subf %247, %263 : vector<16x32xf32>
    %cst_132 = arith.constant 9.99999996E-13 : f32
    %265 = vector.broadcast %cst_132 : f32 to vector<16x1xf32>
    %266 = arith.addf %262, %265 : vector<16x1xf32>
    %267 = math.rsqrt %266 : vector<16x1xf32>
    %268 = vector.broadcast %267 : vector<16x1xf32> to vector<16x32xf32>
    %269 = arith.mulf %264, %268 : vector<16x32xf32>
    %270 = vector.broadcast %249 : vector<1x32xf32> to vector<16x32xf32>
    %271 = arith.mulf %269, %270 : vector<16x32xf32>
    %272 = vector.broadcast %251 : vector<1x32xf32> to vector<16x32xf32>
    %273 = arith.addf %271, %272 : vector<16x32xf32>
    %274 = arith.truncf %273 : vector<16x32xf32> to vector<16x32xbf16>
    %c1_133 = arith.constant 1 : index
    %c0_134 = arith.constant 0 : index
    %c0_135 = arith.constant 0 : index
    %275 = vector.load %arg16[%c1_133, %c0_134, %c0_135] : memref<2x32x64xbf16, #tpu.memory_space<vmem>>, vector<1x32x64xbf16>
    %276 = vector.shape_cast %275 : vector<1x32x64xbf16> to vector<32x64xbf16>
    %cst_136 = arith.constant dense<0.000000e+00> : vector<16x64xf32>
    %277 = tpu.matmul %274, %276, %cst_136 {dimension_numbers = #tpu.dot_dimension_numbers<[1], [0], [0], [1], [0, 0, 1, 1], [], []>} : vector<16x32xbf16>, vector<32x64xbf16>, vector<16x64xf32> -> vector<16x64xf32>
    %c1_137 = arith.constant 1 : index
    %c0_138 = arith.constant 0 : index
    %c0_139 = arith.constant 0 : index
    %278 = vector.load %arg17[%c1_137, %c0_138, %c0_139] : memref<2x1x64xf32, #tpu.memory_space<vmem>>, vector<1x1x64xf32>
    %279 = vector.shape_cast %278 : vector<1x1x64xf32> to vector<1x64xf32>
    %280 = vector.broadcast %279 : vector<1x64xf32> to vector<16x64xf32>
    %281 = arith.addf %277, %280 : vector<16x64xf32>
    %282 = arith.mulf %281, %281 : vector<16x64xf32>
    %283 = arith.mulf %281, %282 : vector<16x64xf32>
    %cst_140 = arith.constant 4.471500e-02 : f32
    %284 = vector.broadcast %cst_140 : f32 to vector<16x64xf32>
    %285 = arith.mulf %284, %283 : vector<16x64xf32>
    %286 = arith.addf %281, %285 : vector<16x64xf32>
    %cst_141 = arith.constant 0.797884583 : f32
    %287 = vector.broadcast %cst_141 : f32 to vector<16x64xf32>
    %288 = arith.mulf %287, %286 : vector<16x64xf32>
    %289 = math.tanh %288 : vector<16x64xf32>
    %cst_142 = arith.constant 1.000000e+00 : f32
    %290 = vector.broadcast %cst_142 : f32 to vector<16x64xf32>
    %291 = arith.addf %290, %289 : vector<16x64xf32>
    %cst_143 = arith.constant 5.000000e-01 : f32
    %292 = vector.broadcast %cst_143 : f32 to vector<16x64xf32>
    %293 = arith.mulf %292, %291 : vector<16x64xf32>
    %294 = arith.mulf %281, %293 : vector<16x64xf32>
    %295 = arith.truncf %294 : vector<16x64xf32> to vector<16x64xbf16>
    %c1_144 = arith.constant 1 : index
    %c0_145 = arith.constant 0 : index
    %c0_146 = arith.constant 0 : index
    %296 = vector.load %arg18[%c1_144, %c0_145, %c0_146] : memref<2x64x32xbf16, #tpu.memory_space<vmem>>, vector<1x64x32xbf16>
    %297 = vector.shape_cast %296 : vector<1x64x32xbf16> to vector<64x32xbf16>
    %cst_147 = arith.constant dense<0.000000e+00> : vector<16x32xf32>
    %298 = tpu.matmul %295, %297, %cst_147 {dimension_numbers = #tpu.dot_dimension_numbers<[1], [0], [0], [1], [0, 0, 1, 1], [], []>} : vector<16x64xbf16>, vector<64x32xbf16>, vector<16x32xf32> -> vector<16x32xf32>
    %c1_148 = arith.constant 1 : index
    %c0_149 = arith.constant 0 : index
    %c0_150 = arith.constant 0 : index
    %299 = vector.load %arg19[%c1_148, %c0_149, %c0_150] : memref<2x1x32xf32, #tpu.memory_space<vmem>>, vector<1x1x32xf32>
    %300 = vector.shape_cast %299 : vector<1x1x32xf32> to vector<1x32xf32>
    %301 = vector.broadcast %300 : vector<1x32xf32> to vector<16x32xf32>
    %302 = arith.addf %298, %301 : vector<16x32xf32>
    %303 = arith.addf %273, %302 : vector<16x32xf32>
    %c1_151 = arith.constant 1 : index
    %c0_152 = arith.constant 0 : index
    %c0_153 = arith.constant 0 : index
    %304 = vector.load %arg20[%c1_151, %c0_152, %c0_153] : memref<2x1x32xf32, #tpu.memory_space<vmem>>, vector<1x1x32xf32>
    %305 = vector.shape_cast %304 : vector<1x1x32xf32> to vector<1x32xf32>
    %c1_154 = arith.constant 1 : index
    %c0_155 = arith.constant 0 : index
    %c0_156 = arith.constant 0 : index
    %306 = vector.load %arg21[%c1_154, %c0_155, %c0_156] : memref<2x1x32xf32, #tpu.memory_space<vmem>>, vector<1x1x32xf32>
    %307 = vector.shape_cast %306 : vector<1x1x32xf32> to vector<1x32xf32>
    %cst_157 = arith.constant dense<0.000000e+00> : vector<16xf32>
    %308 = vector.multi_reduction <add>, %303, %cst_157 [1] : vector<16x32xf32> to vector<16xf32>
    %309 = vector.shape_cast %308 : vector<16xf32> to vector<16x1xf32>
    %cst_158 = arith.constant 3.200000e+01 : f32
    %310 = vector.broadcast %cst_158 : f32 to vector<16x1xf32>
    %311 = arith.divf %309, %310 : vector<16x1xf32>
    %312 = vector.broadcast %311 : vector<16x1xf32> to vector<16x32xf32>
    %313 = arith.subf %303, %312 : vector<16x32xf32>
    %314 = arith.mulf %313, %313 : vector<16x32xf32>
    %cst_159 = arith.constant dense<0.000000e+00> : vector<16xf32>
    %315 = vector.multi_reduction <add>, %314, %cst_159 [1] : vector<16x32xf32> to vector<16xf32>
    %316 = vector.shape_cast %315 : vector<16xf32> to vector<16x1xf32>
    %cst_160 = arith.constant 3.200000e+01 : f32
    %317 = vector.broadcast %cst_160 : f32 to vector<16x1xf32>
    %318 = arith.divf %316, %317 : vector<16x1xf32>
    %319 = vector.broadcast %311 : vector<16x1xf32> to vector<16x32xf32>
    %320 = arith.subf %303, %319 : vector<16x32xf32>
    %cst_161 = arith.constant 9.99999996E-13 : f32
    %321 = vector.broadcast %cst_161 : f32 to vector<16x1xf32>
    %322 = arith.addf %318, %321 : vector<16x1xf32>
    %323 = math.rsqrt %322 : vector<16x1xf32>
    %324 = vector.broadcast %323 : vector<16x1xf32> to vector<16x32xf32>
    %325 = arith.mulf %320, %324 : vector<16x32xf32>
    %326 = vector.broadcast %305 : vector<1x32xf32> to vector<16x32xf32>
    %327 = arith.mulf %325, %326 : vector<16x32xf32>
    %328 = vector.broadcast %307 : vector<1x32xf32> to vector<16x32xf32>
    %329 = arith.addf %327, %328 : vector<16x32xf32>
    %c0_162 = arith.constant 0 : index
    %c0_163 = arith.constant 0 : index
    %330 = vector.load %arg4[%c0_162, %c0_163] : memref<2x16xf32, #tpu.memory_space<vmem>>, vector<2x16xf32>
    %cst_164 = arith.constant dense<0.000000e+00> : vector<2x32xf32>
    %331 = tpu.matmul %330, %329, %cst_164 {dimension_numbers = #tpu.dot_dimension_numbers<[1], [0], [0], [1], [0, 0, 1, 1], [], []>} : vector<2x16xf32>, vector<16x32xf32>, vector<2x32xf32> -> vector<2x32xf32>
    %332 = arith.truncf %331 : vector<2x32xf32> to vector<2x32xbf16>
    %c0_165 = arith.constant 0 : index
    %c0_166 = arith.constant 0 : index
    %333 = vector.load %arg22[%c0_165, %c0_166] : memref<32x32xbf16, #tpu.memory_space<vmem>>, vector<32x32xbf16>
    %cst_167 = arith.constant dense<0.000000e+00> : vector<2x32xf32>
    %334 = tpu.matmul %332, %333, %cst_167 {dimension_numbers = #tpu.dot_dimension_numbers<[1], [0], [0], [1], [0, 0, 1, 1], [], []>} : vector<2x32xbf16>, vector<32x32xbf16>, vector<2x32xf32> -> vector<2x32xf32>
    %c0_168 = arith.constant 0 : index
    %c0_169 = arith.constant 0 : index
    %335 = vector.load %arg23[%c0_168, %c0_169] : memref<1x32xf32, #tpu.memory_space<vmem>>, vector<1x32xf32>
    %336 = vector.broadcast %335 : vector<1x32xf32> to vector<2x32xf32>
    %337 = arith.addf %334, %336 : vector<2x32xf32>
    %338 = math.tanh %337 : vector<2x32xf32>
    %c0_170 = arith.constant 0 : index
    %c0_171 = arith.constant 0 : index
    %339 = vector.load %arg2[%c0_170, %c0_171] : memref<2x4xf32, #tpu.memory_space<vmem>>, vector<2x4xf32>
    %c0_172 = arith.constant 0 : index
    %c0_173 = arith.constant 0 : index
    %340 = vector.load %arg24[%c0_172, %c0_173] : memref<32x16xf32, #tpu.memory_space<vmem>>, vector<32x16xf32>
    %cst_174 = arith.constant dense<0.000000e+00> : vector<2x16xf32>
    %341 = tpu.matmul %338, %340, %cst_174 {dimension_numbers = #tpu.dot_dimension_numbers<[1], [0], [0], [1], [0, 0, 1, 1], [], []>} : vector<2x32xf32>, vector<32x16xf32>, vector<2x16xf32> -> vector<2x16xf32>
    %c0_175 = arith.constant 0 : index
    %c0_176 = arith.constant 0 : index
    %342 = vector.load %arg25[%c0_175, %c0_176] : memref<4x16xf32, #tpu.memory_space<vmem>>, vector<4x16xf32>
    %cst_177 = arith.constant dense<0.000000e+00> : vector<2x16xf32>
    %343 = tpu.matmul %339, %342, %cst_177 {dimension_numbers = #tpu.dot_dimension_numbers<[1], [0], [0], [1], [0, 0, 1, 1], [], []>} : vector<2x4xf32>, vector<4x16xf32>, vector<2x16xf32> -> vector<2x16xf32>
    %344 = arith.addf %341, %343 : vector<2x16xf32>
    %c0_178 = arith.constant 0 : index
    %c0_179 = arith.constant 0 : index
    %345 = vector.load %arg26[%c0_178, %c0_179] : memref<1x16xf32, #tpu.memory_space<vmem>>, vector<1x16xf32>
    %346 = vector.broadcast %345 : vector<1x16xf32> to vector<2x16xf32>
    %347 = arith.addf %344, %346 : vector<2x16xf32>
    %348 = arith.negf %347 : vector<2x16xf32>
    %349 = math.exp %348 : vector<2x16xf32>
    %cst_180 = arith.constant 1.000000e+00 : f32
    %350 = vector.broadcast %cst_180 : f32 to vector<2x16xf32>
    %351 = arith.addf %350, %349 : vector<2x16xf32>
    %352 = arith.divf %350, %351 : vector<2x16xf32>
    %353 = arith.mulf %347, %352 : vector<2x16xf32>
    %c0_181 = arith.constant 0 : index
    %c0_182 = arith.constant 0 : index
    %354 = vector.load %arg27[%c0_181, %c0_182] : memref<16x16xf32, #tpu.memory_space<vmem>>, vector<16x16xf32>
    %cst_183 = arith.constant dense<0.000000e+00> : vector<2x16xf32>
    %355 = tpu.matmul %353, %354, %cst_183 {dimension_numbers = #tpu.dot_dimension_numbers<[1], [0], [0], [1], [0, 0, 1, 1], [], []>} : vector<2x16xf32>, vector<16x16xf32>, vector<2x16xf32> -> vector<2x16xf32>
    %c0_184 = arith.constant 0 : index
    %c0_185 = arith.constant 0 : index
    %356 = vector.load %arg28[%c0_184, %c0_185] : memref<1x16xf32, #tpu.memory_space<vmem>>, vector<1x16xf32>
    %357 = vector.broadcast %356 : vector<1x16xf32> to vector<2x16xf32>
    %358 = arith.addf %355, %357 : vector<2x16xf32>
    %c0_186 = arith.constant 0 : index
    %c0_187 = arith.constant 0 : index
    %359 = vector.load %arg29[%c0_186, %c0_187] : memref<2x16xf32, #tpu.memory_space<vmem>>, vector<2x16xf32>
    tpu.vector_store %arg29[%c0_186, %c0_187], %358 {strides = array<i32>} : memref<2x16xf32, #tpu.memory_space<vmem>>, vector<2x16xf32>,
    return
  }
}

</mosaic_0001>

<bundles_post_ra>
// kernel: bert_classifier_forward.1
= control target key start
LH: loop header
LB: loop body
LE: loop exit
PB: predicated region body
PF: predicated region fallthrough
CT: control target
= control target key end

     0   :  { %s1938_s6 = smov 1   ;;  %s1939_s10 = smov 2   ;;  %s2353_s0 = inlined_call_operand.smem [shape: u32[30], index: -1, kind: input, shape index: {}] }
   0x1   :  { %s1984_s5 = sld [smem:[%s2353_s0]]   ;;  %s1940_s14 = smov 3  }
   0x2   :  { %s1989_s9 = sld [smem:[%s2353_s0 + %s1938_s6]]   ;;  %s1941_s18 = smov 4  }
   0x3   :  { %s1994_s13 = sld [smem:[%s2353_s0 + %s1939_s10]]   ;;  %s1942_s22 = smov 5  }
   0x4   :  { %s1999_s17 = sld [smem:[%s2353_s0 + %s1940_s14]]   ;;  %s1943_s26 = smov 6  }
   0x5   :  { %s2004_s21 = sld [smem:[%s2353_s0 + %s1941_s18]]   ;;  %s1944_s30 = smov 7  }
   0x6   :  { %s2009_s25 = sld [smem:[%s2353_s0 + %s1942_s22]]   ;;  %s1945_s4 = smov 8  }
   0x7   :  { %s2014_s29 = sld [smem:[%s2353_s0 + %s1943_s26]]   ;;  %s1946_s10 = smov 9  }
   0x8   :  { %s2019_s3 = sld [smem:[%s2353_s0 + %s1944_s30]]   ;;  %s1947_s15 = smov 10  }
   0x9   :  { %2362 = sst [smem:[#allocation5_spill]] %s1994_s13  ;;  %s1948_s20 = smov 11  }
   0xa   :  { %s2024_s8 = sld [smem:[%s2353_s0 + %s1945_s4]]   ;;  %s1949_s26 = smov 12  }
   0xb   :  { %2363 = sst [smem:[#allocation6_spill]] %s2004_s21  ;;  %s1950_s1 = smov 13  }
   0xc   :  { %s2029_s14 = sld [smem:[%s2353_s0 + %s1946_s10]]   ;;  %s1951_s7 = smov 14  }
   0xd   :  { %s2034_s19 = sld [smem:[%s2353_s0 + %s1947_s15]]   ;;  %s1952_s15 = smov 15  }
   0xe   :  { %s2039_s24 = sld [smem:[%s2353_s0 + %s1948_s20]]   ;;  %s1953_s22 = smov 16  }
   0xf   :  { %s2044_s30 = sld [smem:[%s2353_s0 + %s1949_s26]]   ;;  %s1954_s28 = smov 17  }
  0x10   :  { %s2049_s6 = sld [smem:[%s2353_s0 + %s1950_s1]]  }
  0x11   :  { %s2054_s12 = sld [smem:[%s2353_s0 + %s1951_s7]]   ;;  %s1955_s7 = smov 18  }
  0x12   :  { %s2059_s20 = sld [smem:[%s2353_s0 + %s1952_s15]]   ;;  %s1956_s15 = smov 19  }
  0x13   :  { %s2064_s27 = sld [smem:[%s2353_s0 + %s1953_s22]]   ;;  %s1957_s22 = smov 20  }
  0x14   :  { %s2069_s4 = sld [smem:[%s2353_s0 + %s1954_s28]]   ;;  %s1958_s28 = smov 21  }
  0x15   :  { %s2074_s13 = sld [smem:[%s2353_s0 + %s1955_s7]]   ;;  %s1959_s7 = smov 22  }
  0x16   :  { %s2079_s21 = sld [smem:[%s2353_s0 + %s1956_s15]]   ;;  %s1960_s15 = smov 23  }
  0x18   :  { %2364 = sst [smem:[#allocation7_spill]] %s2059_s20 }
  0x19   :  { %s2084_s20 = sld [smem:[%s2353_s0 + %s1957_s22]]   ;;  %s1961_s22 = smov 24  }
  0x1a   :  { %2365 = sst [smem:[#allocation8_spill]] %s2069_s4 }
  0x1b   :  { %2366 = sst [smem:[#allocation9_spill]] %s2074_s13 }
  0x1c   :  { %2367 = sst [smem:[#allocation10_spill]] %s2079_s21 }
  0x1d   :  { %s2089_s4 = sld [smem:[%s2353_s0 + %s1958_s28]]   ;;  %s1962_s28 = smov 25  }
  0x1e   :  { %s2094_s13 = sld [smem:[%s2353_s0 + %s1959_s7]]   ;;  %s1963_s7 = smov 26  }
  0x1f   :  { %2368 = sst [smem:[#allocation11_spill]] %s2084_s20 }
  0x20   :  { %s2099_s21 = sld [smem:[%s2353_s0 + %s1960_s15]]   ;;  %s1964_s15 = smov 27  }
  0x21   :  { %s2104_s20 = sld [smem:[%s2353_s0 + %s1961_s22]]   ;;  %s1965_s22 = smov 28  }
  0x23   :  { %2369 = sst [smem:[#allocation12_spill]] %s2089_s4 }
  0x24   :  { %2370 = sst [smem:[#allocation13_spill]] %s2094_s13 }
  0x25   :  { %s2109_s4 = sld [smem:[%s2353_s0 + %s1962_s28]]   ;;  %s1966_s28 = smov 29  }
  0x26   :  { %2371 = sst [smem:[#allocation14_spill]] %s2099_s21 }
  0x27   :  { %2372 = sst [smem:[#allocation15_spill]] %s2104_s20 }
  0x28   :  { %s2114_s13 = sld [smem:[%s2353_s0 + %s1963_s7]]  }
  0x29   :  { %s2119_s21 = sld [smem:[%s2353_s0 + %s1964_s15]]  }
  0x2a   :  { %s2124_s20 = sld [smem:[%s2353_s0 + %s1965_s22]]  }
  0x2b   :  { %2373 = sst [smem:[#allocation16_spill]] %s2109_s4 }
  0x2c   :  { %s2129_s4 = sld [smem:[%s2353_s0 + %s1966_s28]]  }
  0x2d   :  { %v124_v0 = vld [vmem:[%s1984_s5] sm:$0xff]  ;;  %vm193_vm0 = vcmask 1043456   ;;  %vm156_vm1 = vcmask 64512   ;;  %v1967_v2 = vmov 0   ;;  %v151_v4 = vld [vmem:[%s2009_s25 + $0x58] sm:$0xff]  ;;  %v150_v6 = vld [vmem:[%s2009_s25 + $0x50] sm:$0xff] }
  0x2e   :  { %v155_v1 = vld [vmem:[%s2014_s29] sm:$0xff]  ;;  %1801 = vset.pattern.permute.xlu0 %v1967_v2  ;;  %v125_v7 = vld [vmem:[%s1984_s5 + $0x8] sm:$0xff]  ;;  %v147_v11 = vld [vmem:[%s2009_s25 + $0x38] sm:$0xff] }
  0x2f   :  { %178 = vmatpush.msra.mxu1 %v155_v1  ;;  %v152_v3 = vld [vmem:[%s2009_s25 + $0x60] sm:$0xf]  ;;  %129 = vperm.xlu0 %1801, %v124_v0   ;;  %v149_v8 = vld [vmem:[%s2009_s25 + $0x48] sm:$0xff]  ;;  %v146_v12 = vld [vmem:[%s2009_s25 + $0x30] sm:$0xff] }
  0x30   :  { %v153_v5 = vld [vmem:[%s1999_s17] sm:$0xff]  ;;  %v154_v10 = vld [vmem:[%s1999_s17 + $0x8] sm:$0xff] }
  0x31   :  { %1577 = vmatpush.msk.msrb.mxu1 %vm193_vm0, %v152_v3  ;;  %v148_v9 = vld [vmem:[%s2009_s25 + $0x40] sm:$0xff]  ;;  %v145_v13 = vld [vmem:[%s2009_s25 + $0x28] sm:$0xff] }
  0x32   :  { %1575 = vmatmul.msk.f32.vlgmr.msra.gmra.mxu1 %vm156_vm1, %v153_v5 }
  0x33   :  { %201 = vmatpush.msrb.mxu1 %v151_v4 }
  0x35   :  { %202 = vmatpush.msrb.mxu1 %v150_v6 }
  0x37   :  { %203 = vmatpush.msrb.mxu1 %v149_v8  ;;  %132 = vperm.xlu0 %1801, %v125_v7  }
  0x39   :  { %204 = vmatpush.msrb.mxu1 %v148_v9 }
  0x3a   :  { %1576 = vmatmul.msk.f32.gmra.mxu1 %vm156_vm1, %v154_v10 }
  0x3b   :  { %205 = vmatpush.msrb.mxu1 %v147_v11 }
  0x3c   :  { %64 = vsyncpa [#allocation3], 0  ;;  %v144_v14 = vld [vmem:[%s2009_s25 + $0x20] sm:$0xff]  ;;  %v143_v15 = vld [vmem:[%s2009_s25 + $0x18] sm:$0xff]  ;;  %v126_v19 = vlaneseq  ;;  %vm186_vm2 = vcmask 818176   ;;  %v1968_v22 = vmov 0.0  }
  0x3d   :  { %206 = vmatpush.msrb.mxu1 %v146_v12  ;;  %v142_v16 = vld [vmem:[%s2009_s25 + $0x10] sm:$0xff]  ;;  %v141_v17 = vld [vmem:[%s2009_s25 + $0x8] sm:$0xff]  ;;  %v140_v18 = vld [vmem:[%s2009_s25] sm:$0xff]  ;;  %vm228_vm5 = vcmask 261120   ;;  %v1969_v37 = vmov 32.0   ;;  %s1970_s0 = smov 96  }
  0x3e   :  { %v127_v20 = vand.u32 127, %v126_v19  ;;  %v1822_v28 = vld [vmem:[%s2019_s3] ss:$0 sm:$0xff]  ;;  %1844 = vrcp.f32 %v1969_v37  ;;  %v1740_v54 = vld [vmem:[%s2034_s19 + $0x8] sm:$0xff]  ;;  %s1971_s5 = smov 80   ;;  %s1972_s17 = smov 112  }
  0x3f   :  { %207 = vmatpush.msrb.mxu1 %v145_v13  ;;  %322 = vmatpush.bf16.msra.mxu2 %v1740_v54  ;;  %v1739_v56 = vld [vmem:[%s2034_s19] sm:$0xff]  ;;  %vm341_vm13 = vcmask 130048   ;;  %s1974_s25 = smov 48   ;;  %s2374_s29 = sld [smem:[#allocation7_spill]] }
  0x40   :  { %v1823_v11 = vld [vmem:[%s2024_s8] ss:$0 sm:$0xff]  ;;  %s2375_s3 = sld [smem:[#allocation9_spill]]  ;;  %s1535_s11 = sshll.u32 %s2129_s4, 4  ;;  %s1536_s11 = int_to_ptr.hbm [resolvable:$true] %s1535_s11 }
  0x41   :  { %208 = vmatpush.msrb.mxu1 %v144_v14  ;;  %s2376_s8 = sld [smem:[#allocation8_spill]]  ;;  %s1924_s15 = sshra.s32 %s1536_s11, 4  ;;  %s1925_s15 = int_to_ptr.hbm [resolvable:$true] %s1924_s15 }
  0x42   :  { %s2378_s7 = sld [smem:[#allocation11_spill]]  ;;  %s1926_s16 = scalar_lea.hbm %s1925_s15, 2 }
  0x43   :  { %209 = vmatpush.msrb.mxu1 %v143_v15  ;;  %323 = vmatpush.bf16.msra.mxu2 %v1739_v56  ;;  %s2379_s10 = sld [smem:[#allocation12_spill]]  ;;  %p1927_p0 = scmp.ne.s32.totalorder %s1925_s15, %s1926_s16 }
  0x44   :  { %v1845_v38 = vpop.eup %1844  ;;  %s1928_s18 = scalar_lea.hbm %s2129_s4, 2  ;;  %p1929_p1 = scmp.lt.s32.totalorder %s1925_s15, %s2129_s4 }
  0x45   :  { %210 = vmatpush.msrb.mxu1 %v142_v16  ;;  %v236_v39 = vmul.f32 32.0, %v1845_v38  ;;  %vm240_vm6 = vweird.f32 %v1845_v38  ;;  %v1824_v16 = vld [vmem:[%s2029_s14] ss:$0 sm:$0xff]  ;;  %s2377_s14 = sld [smem:[#allocation10_spill]]  ;;  %p1930_p2 = scmp.lt.s32.totalorder %s1928_s18, %s1926_s16 }
  0x47   :  { %211 = vmatpush.msrb.mxu1 %v141_v17  ;;  %v237_v40 = vsub.f32 1.0, %v236_v39  ;;  %p1931_p3 = por %p1930_p2, %p1929_p1 }
  0x49   :  { %212 = vmatpush.msrb.mxu1 %v140_v18  ;;  %v238_v41 = vmul.f32 %v1845_v38, %v237_v40  ;;  %p1932_p4 = pnand %p1931_p3, %p1927_p0 }
  0x4b   :  { %v239_v42 = vadd.f32 %v1845_v38, %v238_v41 }
  0x4d   :  { %v2155_v43 = vsel %vm240_vm6, %v1845_v38, %v239_v42  ;;  %v2195_v38 = vld [vmem:[%s1989_s9 + $0x8] sm:$0xff]  ;;  %vm742_vm6 = vcmask 523264  }
  0xa1   :  { %v130_v21 = vpop.permute.xlu0 %129 }
  0xa2   :  { %vm134_vm3 = vcmp.eq.s32.totalorder %v130_v21, %v127_v20  ;;  %v1825_v21 = vld [vmem:[%s2039_s24] ss:$0 sm:$0xff] }
  0xa3   :  { %v1573_v23 = vsel %vm134_vm3, 1.0, %v1968_v22 }
  0xa4   :  { %1578 = vmatmul.msk.f32.vlgmr.msrb.gmra.mxu1 %vm186_vm2, %v1573_v23 }
  0xa9   :  { %v133_v24 = vpop.permute.xlu0 %132 }
  0xaa   :  { %vm135_vm4 = vcmp.eq.s32.totalorder %v133_v24, %v127_v20 }
  0xab   :  { %v1574_v25 = vsel %vm135_vm4, 1.0, %v1968_v22 }
  0xac   :  { %1579 = vmatmul.msk.f32.gmra.mxu1 %vm186_vm2, %v1574_v25 }
  0xaf   :  { %v180_v26 = vpop.f32.mrf.mxu1 }
  0xb7   :  { %v183_v27 = vpop.f32.mrf.mxu1 }
 0x121   :  { %v214_v29 = vpop.f32.mrf.mxu1 }
 0x122   :  { %v215_v30 = vadd.f32 %v214_v29, %v180_v26 }
 0x124   :  { %v224_v31 = vadd.f32 %v1822_v28, %v215_v30 }
 0x126   :  { %v229_v32 = vsel %vm228_vm5, %v224_v31, 0.0 }
 0x127   :  { %230 = vadd.xlane.f32.xlu1 %v229_v32 }
 0x129   :  { %v217_v33 = vpop.f32.mrf.mxu1 }
 0x12a   :  { %v218_v34 = vadd.f32 %v217_v33, %v183_v27  ;;  %v2190_v33 = vld [vmem:[%s1989_s9] sm:$0xff]  ;;  %s1973_s9 = smov 64  }
 0x12c   :  { %v225_v35 = vadd.f32 %v1822_v28, %v218_v34 }
 0x12e   :  { %v232_v36 = vsel %vm228_vm5, %v225_v35, 0.0 }
 0x12f   :  { %233 = vadd.xlane.f32.xlu1 %v232_v36 }
 0x19a   :  { %v231_v44 = vpop.xlane.xlu1 %230 }
 0x19b   :  { %v242_v45 = vmul.f32 %v2155_v43, %v231_v44 }
 0x19d   :  { %v244_v46 = vsub.f32 %v224_v31, %v242_v45 }
 0x19f   :  { %v246_v47 = vmul.f32 %v244_v46, %v244_v46 }
 0x1a1   :  { %v248_v48 = vsel %vm228_vm5, %v246_v47, 0.0 }
 0x1a2   :  { %249 = vadd.xlane.f32.xlu2 %v248_v48  ;;  %v234_v49 = vpop.xlane.xlu1 %233 }
 0x1a3   :  { %v243_v50 = vmul.f32 %v2155_v43, %v234_v49 }
 0x1a5   :  { %v245_v51 = vsub.f32 %v225_v35, %v243_v50 }
 0x1a7   :  { %v247_v52 = vmul.f32 %v245_v51, %v245_v51 }
 0x1a9   :  { %v251_v53 = vsel %vm228_vm5, %v247_v52, 0.0 }
 0x1aa   :  { %252 = vadd.xlane.f32.xlu2 %v251_v53 }
 0x215   :  { %v250_v55 = vpop.xlane.xlu2 %249 }
 0x216   :  { %v254_v57 = vmul.f32 %v250_v55, %v2155_v43 }
 0x218   :  { %v256_v58 = vadd.f32 1e-12, %v254_v57 }
 0x21a   :  { %1846 = vrsqrt.f32 %v256_v58  ;;  %vm264_vm8 = vweird.f32 %v256_v58 }
 0x21d   :  { %v253_v59 = vpop.xlane.xlu2 %252 }
 0x21e   :  { %v255_v60 = vmul.f32 %v253_v59, %v2155_v43 }
 0x220   :  { %v1847_v61 = vpop.eup %1846  ;;  %v257_v62 = vadd.f32 1e-12, %v255_v60 }
 0x221   :  { %v259_v63 = vmul.f32 %v1847_v61, %v256_v58  ;;  %vm265_vm7 = vweird.f32 %v1847_v61 }
 0x222   :  { %1848 = vrsqrt.f32 %v257_v62  ;;  %vm266_vm9 = vmor %vm264_vm8, %vm265_vm7  ;;  %vm274_vm11 = vweird.f32 %v257_v62 }
 0x223   :  { %v260_v0 = vmul.f32 %v1847_v61, %v259_v63 }
 0x225   :  { %v261_v1 = vmul.f32 0.5, %v260_v0 }
 0x227   :  { %v262_v2 = vsub.f32 1.5, %v261_v1 }
 0x228   :  { %v1849_v3 = vpop.eup %1848 }
 0x229   :  { %v263_v4 = vmul.f32 %v1847_v61, %v262_v2  ;;  %v269_v5 = vmul.f32 %v1849_v3, %v257_v62  ;;  %vm275_vm10 = vweird.f32 %v1849_v3 }
 0x22a   :  { %vm276_vm12 = vmor %vm274_vm11, %vm275_vm10 }
 0x22b   :  { %v270_v6 = vmul.f32 %v1849_v3, %v269_v5  ;;  %v267_v7 = vsel %vm266_vm9, %v1847_v61, %v263_v4 }
 0x22c   :  { %v278_v10 = vmul.f32 %v267_v7, %v244_v46 }
 0x22d   :  { %v271_v8 = vmul.f32 0.5, %v270_v6 }
 0x22e   :  { %v283_v15 = vmul.f32 %v1823_v11, %v278_v10 }
 0x22f   :  { %v272_v9 = vsub.f32 1.5, %v271_v8 }
 0x230   :  { %v2167_v18 = vadd.f32 %v1824_v16, %v283_v15 }
 0x231   :  { %v273_v12 = vmul.f32 %v1849_v3, %v272_v9 }
 0x233   :  { %v277_v13 = vsel %vm276_vm12, %v1849_v3, %v273_v12 }
 0x234   :  { %v279_v14 = vmul.f32 %v277_v13, %v245_v51 }
 0x236   :  { %v284_v17 = vmul.f32 %v1823_v11, %v279_v14 }
 0x238   :  { %v2169_v19 = vadd.f32 %v1824_v16, %v284_v17 }
 0x23a   :  { %v292_v20 = vpack.c.bf16 %v2169_v19, %v2167_v18 }
 0x23c   :  { %1588 = vmatmul.msk.bf16.vlgmr.msra.gmra.mxu2 %vm228_vm5, %v292_v20 }
 0x2bf   :  { %v325_v22 = vpop.f32.mrf.mxu2 }
 0x2c0   :  { %v326_v23 = vadd.f32 %v1825_v21, %v325_v22 }
 0x2c2   :  { %337 = vrot.lane.b32.xlu1 %v326_v23, %s1970_s0 }
 0x2c7   :  { %v327_v24 = vpop.f32.mrf.mxu2 }
 0x2c8   :  { %v328_v25 = vadd.f32 %v1825_v21, %v327_v24 }
 0x2ca   :  { %468 = vrot.lane.b32.xlu2 %v328_v25, %s1971_s5  ;;  %339 = vrot.lane.b32.xlu0 %v328_v25, %s1970_s0  ;;  %v1802_v51 = vpack.i.bf16 %v326_v23, %v328_v25 }
 0x2d2   :  { %466 = vrot.lane.b32.xlu0 %v326_v23, %s1971_s5 }
 0x2da   :  { %462 = vrot.lane.b32.xlu0 %v326_v23, %s1972_s17 }
 0x2e2   :  { %464 = vrot.lane.b32.xlu0 %v328_v25, %s1972_s17 }
 0x324   :  { %v469_v28 = vpop.permute.xlu2 %468 }
 0x334   :  { %v338_v27 = vpop.permute.xlu1 %337 }
 0x33c   :  { %v340_v26 = vpop.permute.xlu0 %339 }
 0x33d   :  { %1589 = vmatpush.xpose.msk.msra.mxu3 %vm341_vm13, %v340_v26 }
 0x341   :  { %1590 = vmatpush.xpose.msk.msra.mxu3 %vm341_vm13, %v338_v27 }
 0x344   :  { %v467_v29 = vpop.permute.xlu0 %466  ;;  %1591 = vmatmul.msk.f32.vlgmr.msra.gmra.mxu3 %vm341_vm13, %v326_v23 }
 0x345   :  { %1600 = vmatpush.xpose.msk.msrb.mxu3 %vm341_vm13, %v469_v28  ;;  %v1741_v28 = vld [vmem:[%s2044_s30] sm:$0xff] }
 0x346   :  { %453 = vmatpush.bf16.msrb.mxu2 %v1741_v28 }
 0x349   :  { %1601 = vmatpush.xpose.msk.msrb.mxu3 %vm341_vm13, %v467_v29  ;;  %v1742_v29 = vld [vmem:[%s2044_s30 + $0x8] sm:$0xff] }
 0x34a   :  { %582 = vmatpush.bf16.msra.mxu2 %v1742_v29  ;;  %v1748_v29 = vld [vmem:[%s2375_s3 + $0x18] sm:$0xff] }
 0x34b   :  { %750 = vmatpush.bf16.msra.mxu1 %v1748_v29 }
 0x34c   :  { %1592 = vmatmul.msk.f32.gmra.mxu3 %vm341_vm13, %v328_v25  ;;  %v463_v30 = vpop.permute.xlu0 %462 }
 0x354   :  { %1602 = vmatmul.msk.f32.vlgmr.msrb.gmra.mxu3 %vm341_vm13, %v463_v30  ;;  %v465_v31 = vpop.permute.xlu0 %464 }
 0x35c   :  { %1603 = vmatmul.msk.f32.gmra.mxu3 %vm341_vm13, %v465_v31 }
 0x3c7   :  { %v367_v32 = vpop.f32.mrf.mxu3 }
 0x3c8   :  { %v373_v34 = vmul.f32 0.25, %v367_v32 }
 0x3ca   :  { %v375_v35 = vadd.f32 %v373_v34, %v2190_v33 }
 0x3cc   :  { %v377_v36 = vsel %vm341_vm13, %v375_v35, -inf }
 0x3cd   :  { %378 = vmax.xlane.f32.xlu2 %v377_v36 }
 0x3cf   :  { %v370_v37 = vpop.f32.mrf.mxu3 }
 0x3d0   :  { %v374_v39 = vmul.f32 0.25, %v370_v37 }
 0x3d2   :  { %v376_v40 = vadd.f32 %v374_v39, %v2195_v38 }
 0x3d4   :  { %v380_v41 = vsel %vm341_vm13, %v376_v40, -inf }
 0x3d5   :  { %381 = vmax.xlane.f32.xlu1 %v380_v41 }
 0x3d7   :  { %v495_v42 = vpop.f32.mrf.mxu3 }
 0x3d8   :  { %v501_v44 = vmul.f32 0.25, %v495_v42 }
 0x3da   :  { %v503_v45 = vadd.f32 %v501_v44, %v2190_v33 }
 0x3dc   :  { %v505_v46 = vsel %vm341_vm13, %v503_v45, -inf }
 0x3dd   :  { %506 = vmax.xlane.f32.xlu0 %v505_v46 }
 0x3df   :  { %v498_v47 = vpop.f32.mrf.mxu3 }
 0x3e0   :  { %v502_v48 = vmul.f32 0.25, %v498_v47 }
 0x3e2   :  { %v504_v49 = vadd.f32 %v502_v48, %v2195_v38 }
 0x3e4   :  { %v508_v50 = vsel %vm341_vm13, %v504_v49, -inf }
 0x3e5   :  { %509 = vmax.xlane.f32.xlu2 %v508_v50 }
 0x3fd   :  { %1803 = vrot.lane.b32.xlu2 %v1802_v51, %s1973_s9 }
 0x440   :  { %v379_v52 = vpop.xlane.xlu2 %378 }
 0x441   :  { %v383_v53 = vsub.f32 %v375_v35, %v379_v52 }
 0x443   :  { %v385_v54 = vmul.f32 1.442695, %v383_v53 }
 0x445   :  { %1850 = vpow2.f32 %v385_v54 }
 0x448   :  { %v382_v55 = vpop.xlane.xlu1 %381 }
 0x449   :  { %v384_v56 = vsub.f32 %v376_v40, %v382_v55  ;;  %v1826_v40 = vld [vmem:[%s2049_s6] ss:$0 sm:$0xff] }
 0x44b   :  { %v1851_v57 = vpop.eup %1850  ;;  %v387_v58 = vmul.f32 1.442695, %v384_v56 }
 0x44c   :  { %v389_v59 = vsel %vm341_vm13, %v1851_v57, 0.0 }
 0x44d   :  { %1852 = vpow2.f32 %v387_v58  ;;  %390 = vadd.xlane.f32.xlu1 %v389_v59 }
 0x450   :  { %v507_v60 = vpop.xlane.xlu0 %506 }
 0x451   :  { %v511_v61 = vsub.f32 %v503_v45, %v507_v60 }
 0x453   :  { %v1853_v62 = vpop.eup %1852  ;;  %v513_v63 = vmul.f32 1.442695, %v511_v61 }
 0x454   :  { %v392_v0 = vsel %vm341_vm13, %v1853_v62, 0.0 }
 0x455   :  { %1854 = vpow2.f32 %v513_v63  ;;  %393 = vadd.xlane.f32.xlu0 %v392_v0  ;;  %v1743_v63 = vld [vmem:[%s2064_s27] sm:$0xff] }
 0x458   :  { %v510_v1 = vpop.xlane.xlu2 %509 }
 0x459   :  { %v512_v2 = vsub.f32 %v504_v49, %v510_v1 }
 0x45b   :  { %v1855_v3 = vpop.eup %1854  ;;  %v515_v4 = vmul.f32 1.442695, %v512_v2 }
 0x45c   :  { %v517_v5 = vsel %vm341_vm13, %v1855_v3, 0.0 }
 0x45d   :  { %1856 = vpow2.f32 %v515_v4  ;;  %518 = vadd.xlane.f32.xlu1 %v517_v5 }
 0x460   :  { %v1804_v6 = vpop.permute.xlu2 %1803 }
 0x461   :  { %v1805_v7 = vunpack.i.l.bf16 %v1804_v6  ;;  %v1806_v9 = vunpack.i.h.bf16 %v1804_v6 }
 0x463   :  { %v1857_v8 = vpop.eup %1856  ;;  %425 = vmatpush.msra.mxu0 %v1805_v7 }
 0x464   :  { %v520_v10 = vsel %vm341_vm13, %v1857_v8, 0.0 }
 0x465   :  { %426 = vmatpush.msra.mxu0 %v1806_v9  ;;  %521 = vadd.xlane.f32.xlu1 %v520_v10 }
 0x469   :  { %1808 = vrot.lane.b32.xlu0 %v1802_v51, %s1974_s25 }
 0x4c0   :  { %v391_v11 = vpop.xlane.xlu1 %390 }
 0x4c1   :  { %1858 = vrcp.f32 %v391_v11 }
 0x4c7   :  { %v1859_v12 = vpop.eup %1858 }
 0x4c8   :  { %v394_v13 = vpop.xlane.xlu0 %393  ;;  %v397_v14 = vmul.f32 %v1859_v12, %v1851_v57 }
 0x4c9   :  { %1860 = vrcp.f32 %v394_v13 }
 0x4ca   :  { %1593 = vmatmul.msk.f32.vlgmr.msra.gmra.mxu0 %vm341_vm13, %v397_v14 }
 0x4cf   :  { %v1861_v15 = vpop.eup %1860 }
 0x4d0   :  { %v398_v16 = vmul.f32 %v1861_v15, %v1853_v62  ;;  %v519_v17 = vpop.xlane.xlu1 %518 }
 0x4d1   :  { %1862 = vrcp.f32 %v519_v17 }
 0x4d2   :  { %1594 = vmatmul.msk.f32.gmra.mxu0 %vm341_vm13, %v398_v16  ;;  %v1827_v16 = vld [vmem:[%s2054_s12] ss:$0 sm:$0xff] }
 0x4d7   :  { %v1863_v22 = vpop.eup %1862 }
 0x4d8   :  { %v522_v20 = vpop.xlane.xlu1 %521  ;;  %v525_v25 = vmul.f32 %v1863_v22, %v1855_v3  ;;  %v1828_v22 = vld [vmem:[%s2374_s29] ss:$0 sm:$0xff] }
 0x4d9   :  { %1864 = vrcp.f32 %v522_v20 }
 0x4db   :  { %v1809_v21 = vpop.permute.xlu0 %1808 }
 0x4dc   :  { %v1810_v23 = vunpack.i.l.bf16 %v1809_v21  ;;  %v1811_v24 = vunpack.i.h.bf16 %v1809_v21 }
 0x4de   :  { %553 = vmatpush.msrb.mxu0 %v1810_v23 }
 0x4df   :  { %v1865_v26 = vpop.eup %1864 }
 0x4e0   :  { %554 = vmatpush.msrb.mxu0 %v1811_v24  ;;  %v526_v27 = vmul.f32 %v1865_v26, %v1857_v8 }
 0x4e1   :  { %1604 = vmatmul.msk.f32.vlgmr.msrb.gmra.mxu0 %vm341_vm13, %v525_v25 }
 0x4e9   :  { %1605 = vmatmul.msk.f32.gmra.mxu0 %vm341_vm13, %v526_v27 }
 0x547   :  { %v428_v30 = vpop.f32.mrf.mxu0 }
 0x54f   :  { %v431_v31 = vpop.f32.mrf.mxu0 }
 0x550   :  { %v434_v32 = vpack.c.bf16 %v431_v31, %v428_v30  ;;  %v1747_v30 = vld [vmem:[%s2375_s3 + $0x10] sm:$0xff]  ;;  %v1746_v31 = vld [vmem:[%s2375_s3 + $0x8] sm:$0xff] }
 0x551   :  { %751 = vmatpush.bf16.msra.mxu1 %v1747_v30 }
 0x552   :  { %1599 = vmatmul.msk.bf16.vlgmr.msrb.gmra.mxu2 %vm341_vm13, %v434_v32  ;;  %v1829_v32 = vld [vmem:[%s2376_s8] ss:$0 sm:$0xff] }
 0x555   :  { %752 = vmatpush.bf16.msra.mxu1 %v1746_v31 }
 0x55e   :  { %v556_v34 = vpop.f32.mrf.mxu0 }
 0x566   :  { %v559_v35 = vpop.f32.mrf.mxu0 }
 0x567   :  { %v562_v36 = vpack.c.bf16 %v559_v35, %v556_v34  ;;  %v1745_v34 = vld [vmem:[%s2375_s3] sm:$0xff] }
 0x568   :  { %753 = vmatpush.bf16.msra.mxu1 %v1745_v34 }
 0x569   :  { %1612 = vmatmul.msk.bf16.vlgmr.msra.gmra.mxu2 %vm341_vm13, %v562_v36 }
 0x5d5   :  { %v455_v37 = vpop.f32.mrf.mxu2 }
 0x5d6   :  { %v460_v41 = vadd.f32 %v1826_v40, %v455_v37 }
 0x5dd   :  { %v457_v39 = vpop.f32.mrf.mxu2 }
 0x5de   :  { %v461_v47 = vadd.f32 %v1826_v40, %v457_v39 }
 0x5ec   :  { %v584_v42 = vpop.f32.mrf.mxu2 }
 0x5ed   :  { %v589_v44 = vadd.f32 %v584_v42, %v460_v41 }
 0x5ef   :  { %v591_v45 = vadd.f32 %v589_v44, %v2167_v18 }
 0x5f1   :  { %v595_v46 = vsel %vm228_vm5, %v591_v45, 0.0 }
 0x5f2   :  { %596 = vadd.xlane.f32.xlu1 %v595_v46 }
 0x5f4   :  { %v586_v48 = vpop.f32.mrf.mxu2 }
 0x5f5   :  { %v590_v49 = vadd.f32 %v586_v48, %v461_v47 }
 0x5f7   :  { %v592_v50 = vadd.f32 %v590_v49, %v2169_v19  ;;  %v1744_v19 = vld [vmem:[%s2064_s27 + $0x8] sm:$0xff] }
 0x5f8   :  { %679 = vmatpush.bf16.msra.mxu3 %v1744_v19 }
 0x5f9   :  { %v598_v51 = vsel %vm228_vm5, %v592_v50, 0.0 }
 0x5fa   :  { %599 = vadd.xlane.f32.xlu2 %v598_v51 }
 0x5fc   :  { %680 = vmatpush.bf16.msra.mxu3 %v1743_v63 }
 0x665   :  { %v597_v52 = vpop.xlane.xlu1 %596 }
 0x666   :  { %v601_v53 = vmul.f32 %v597_v52, %v2155_v43 }
 0x668   :  { %v603_v54 = vsub.f32 %v591_v45, %v601_v53 }
 0x66a   :  { %v605_v55 = vmul.f32 %v603_v54, %v603_v54 }
 0x66c   :  { %v607_v18 = vsel %vm228_vm5, %v605_v55, 0.0 }
 0x66d   :  { %608 = vadd.xlane.f32.xlu1 %v607_v18  ;;  %v600_v56 = vpop.xlane.xlu2 %599 }
 0x66e   :  { %v602_v57 = vmul.f32 %v600_v56, %v2155_v43 }
 0x670   :  { %v604_v58 = vsub.f32 %v592_v50, %v602_v57 }
 0x672   :  { %v606_v59 = vmul.f32 %v604_v58, %v604_v58 }
 0x674   :  { %v610_v60 = vsel %vm228_vm5, %v606_v59, 0.0  ;;  %v1830_v59 = vld [vmem:[%s2377_s14] ss:$0 sm:$0xff] }
 0x675   :  { %611 = vadd.xlane.f32.xlu0 %v610_v60 }
 0x6e0   :  { %v609_v61 = vpop.xlane.xlu1 %608 }
 0x6e1   :  { %v613_v62 = vmul.f32 %v609_v61, %v2155_v43 }
 0x6e3   :  { %v615_v0 = vadd.f32 1e-12, %v613_v62 }
 0x6e5   :  { %1866 = vrsqrt.f32 %v615_v0  ;;  %vm623_vm15 = vweird.f32 %v615_v0 }
 0x6e8   :  { %v612_v1 = vpop.xlane.xlu0 %611 }
 0x6e9   :  { %v614_v2 = vmul.f32 %v612_v1, %v2155_v43 }
 0x6eb   :  { %v1867_v3 = vpop.eup %1866  ;;  %v616_v4 = vadd.f32 1e-12, %v614_v2 }
 0x6ec   :  { %v618_v5 = vmul.f32 %v1867_v3, %v615_v0  ;;  %vm624_vm14 = vweird.f32 %v1867_v3 }
 0x6ed   :  { %1868 = vrsqrt.f32 %v616_v4  ;;  %vm625_vm1 = vmor %vm623_vm15, %vm624_vm14  ;;  %vm633_vm3 = vweird.f32 %v616_v4 }
 0x6ee   :  { %v619_v6 = vmul.f32 %v1867_v3, %v618_v5 }
 0x6f0   :  { %v620_v7 = vmul.f32 0.5, %v619_v6 }
 0x6f2   :  { %v621_v8 = vsub.f32 1.5, %v620_v7 }
 0x6f3   :  { %v1869_v9 = vpop.eup %1868 }
 0x6f4   :  { %v622_v10 = vmul.f32 %v1867_v3, %v621_v8  ;;  %v628_v11 = vmul.f32 %v1869_v9, %v616_v4  ;;  %vm634_vm2 = vweird.f32 %v1869_v9 }
 0x6f5   :  { %vm635_vm4 = vmor %vm633_vm3, %vm634_vm2 }
 0x6f6   :  { %v629_v12 = vmul.f32 %v1869_v9, %v628_v11  ;;  %v626_v13 = vsel %vm625_vm1, %v1867_v3, %v622_v10 }
 0x6f7   :  { %v637_v17 = vmul.f32 %v626_v13, %v603_v54  ;;  %v1750_v13 = vld [vmem:[%s2034_s19 + $0x18] sm:$0xff] }
 0x6f8   :  { %v630_v14 = vmul.f32 0.5, %v629_v12  ;;  %850 = vmatpush.bf16.msra.mxu0 %v1750_v13 }
 0x6f9   :  { %v642_v23 = vmul.f32 %v1827_v16, %v637_v17 }
 0x6fa   :  { %v631_v15 = vsub.f32 1.5, %v630_v14 }
 0x6fb   :  { %v647_v26 = vadd.f32 %v1828_v22, %v642_v23 }
 0x6fc   :  { %v632_v20 = vmul.f32 %v1869_v9, %v631_v15 }
 0x6fe   :  { %v636_v21 = vsel %vm635_vm4, %v1869_v9, %v632_v20 }
 0x6ff   :  { %v638_v24 = vmul.f32 %v636_v21, %v604_v58 }
 0x701   :  { %v643_v25 = vmul.f32 %v1827_v16, %v638_v24  ;;  %v1749_v16 = vld [vmem:[%s2034_s19 + $0x10] sm:$0xff]  ;;  %s2380_s19 = sld [smem:[#allocation13_spill]] }
 0x702   :  { %851 = vmatpush.bf16.msra.mxu0 %v1749_v16 }
 0x703   :  { %v648_v27 = vadd.f32 %v1828_v22, %v643_v25 }
 0x705   :  { %v649_v28 = vpack.c.bf16 %v648_v27, %v647_v26 }
 0x707   :  { %1621 = vmatmul.msk.bf16.vlgmr.msra.gmra.mxu3 %vm228_vm5, %v649_v28 }
 0x78a   :  { %v682_v35 = vpop.f32.mrf.mxu3 }
 0x78b   :  { %v683_v36 = vadd.f32 %v1829_v32, %v682_v35 }
 0x78d   :  { %v687_v37 = vmul.f32 %v683_v36, %v683_v36 }
 0x78f   :  { %v689_v39 = vmul.f32 %v687_v37, %v683_v36 }
 0x791   :  { %v691_v40 = vmul.f32 0.044715, %v689_v39 }
 0x792   :  { %v684_v41 = vpop.f32.mrf.mxu3 }
 0x793   :  { %v693_v42 = vadd.f32 %v691_v40, %v683_v36  ;;  %v685_v44 = vadd.f32 %v1829_v32, %v684_v41  ;;  %v1832_v41 = vld [vmem:[%s2379_s10] ss:$0 sm:$0xff] }
 0x795   :  { %v695_v45 = vmul.f32 0.7978846, %v693_v42  ;;  %v688_v46 = vmul.f32 %v685_v44, %v685_v44 }
 0x797   :  { %v690_v47 = vmul.f32 %v688_v46, %v685_v44  ;;  %1870 = vtanh.f32 %v695_v45 }
 0x799   :  { %v692_v48 = vmul.f32 0.044715, %v690_v47 }
 0x79b   :  { %v694_v49 = vadd.f32 %v692_v48, %v685_v44 }
 0x79d   :  { %v696_v50 = vmul.f32 0.7978846, %v694_v49  ;;  %v1871_v51 = vpop.eup %1870  ;;  %v1833_v49 = vld [vmem:[%s2039_s24 + $0x1] ss:$0 sm:$0xff]  ;;  %s2381_s24 = sld [smem:[#allocation6_spill]] }
 0x79e   :  { %v699_v52 = vadd.f32 1.0, %v1871_v51 }
 0x79f   :  { %1872 = vtanh.f32 %v696_v50 }
 0x7a0   :  { %v701_v54 = vmul.f32 0.5, %v699_v52 }
 0x7a2   :  { %v703_v56 = vmul.f32 %v701_v54, %v683_v36  ;;  %v1831_v36 = vld [vmem:[%s2378_s7] ss:$0 sm:$0xff] }
 0x7a5   :  { %v1873_v53 = vpop.eup %1872 }
 0x7a6   :  { %v700_v55 = vadd.f32 1.0, %v1873_v53 }
 0x7a8   :  { %v702_v18 = vmul.f32 0.5, %v700_v55 }
 0x7aa   :  { %v704_v57 = vmul.f32 %v702_v18, %v685_v44 }
 0x7ac   :  { %v705_v58 = vpack.c.bf16 %v704_v57, %v703_v56 }
 0x7ae   :  { %1638 = vmatmul.msk.bf16.vlgmr.msra.gmra.mxu1 %vm742_vm6, %v705_v58 }
 0x82b   :  { %v755_v60 = vpop.f32.mrf.mxu1 }
 0x82c   :  { %v756_v19 = vadd.f32 %v1830_v59, %v755_v60 }
 0x82e   :  { %v760_v61 = vadd.f32 %v756_v19, %v647_v26 }
 0x830   :  { %v764_v62 = vsel %vm228_vm5, %v760_v61, 0.0 }
 0x831   :  { %765 = vadd.xlane.f32.xlu1 %v764_v62 }
 0x833   :  { %v757_v63 = vpop.f32.mrf.mxu1 }
 0x834   :  { %v758_v0 = vadd.f32 %v1830_v59, %v757_v63 }
 0x836   :  { %v761_v1 = vadd.f32 %v758_v0, %v648_v27 }
 0x838   :  { %v767_v2 = vsel %vm228_vm5, %v761_v1, 0.0 }
 0x839   :  { %768 = vadd.xlane.f32.xlu1 %v767_v2 }
 0x8a4   :  { %v766_v3 = vpop.xlane.xlu1 %765 }
 0x8a5   :  { %v770_v4 = vmul.f32 %v766_v3, %v2155_v43 }
 0x8a7   :  { %v772_v5 = vsub.f32 %v760_v61, %v770_v4 }
 0x8a9   :  { %v774_v6 = vmul.f32 %v772_v5, %v772_v5 }
 0x8ab   :  { %v776_v7 = vsel %vm228_vm5, %v774_v6, 0.0 }
 0x8ac   :  { %777 = vadd.xlane.f32.xlu1 %v776_v7  ;;  %v769_v8 = vpop.xlane.xlu1 %768 }
 0x8ad   :  { %v771_v9 = vmul.f32 %v769_v8, %v2155_v43 }
 0x8af   :  { %v773_v10 = vsub.f32 %v761_v1, %v771_v9 }
 0x8b1   :  { %v775_v11 = vmul.f32 %v773_v10, %v773_v10 }
 0x8b3   :  { %v779_v12 = vsel %vm228_vm5, %v775_v11, 0.0 }
 0x8b4   :  { %780 = vadd.xlane.f32.xlu1 %v779_v12 }
 0x91f   :  { %v778_v14 = vpop.xlane.xlu1 %777 }
 0x920   :  { %v782_v15 = vmul.f32 %v778_v14, %v2155_v43 }
 0x922   :  { %v784_v17 = vadd.f32 1e-12, %v782_v15 }
 0x924   :  { %1874 = vrsqrt.f32 %v784_v17  ;;  %vm792_vm8 = vweird.f32 %v784_v17 }
 0x927   :  { %v781_v20 = vpop.xlane.xlu1 %780 }
 0x928   :  { %v783_v21 = vmul.f32 %v781_v20, %v2155_v43 }
 0x92a   :  { %v1875_v22 = vpop.eup %1874  ;;  %v785_v23 = vadd.f32 1e-12, %v783_v21 }
 0x92b   :  { %v787_v24 = vmul.f32 %v1875_v22, %v784_v17  ;;  %vm793_vm7 = vweird.f32 %v1875_v22 }
 0x92c   :  { %1876 = vrsqrt.f32 %v785_v23  ;;  %vm794_vm9 = vmor %vm792_vm8, %vm793_vm7  ;;  %vm802_vm11 = vweird.f32 %v785_v23 }
 0x92d   :  { %v788_v25 = vmul.f32 %v1875_v22, %v787_v24 }
 0x92f   :  { %v789_v26 = vmul.f32 0.5, %v788_v25 }
 0x931   :  { %v790_v27 = vsub.f32 1.5, %v789_v26 }
 0x932   :  { %v1877_v28 = vpop.eup %1876 }
 0x933   :  { %v791_v29 = vmul.f32 %v1875_v22, %v790_v27  ;;  %v797_v30 = vmul.f32 %v1877_v28, %v785_v23  ;;  %vm803_vm10 = vweird.f32 %v1877_v28 }
 0x934   :  { %vm804_vm12 = vmor %vm802_vm11, %vm803_vm10 }
 0x935   :  { %v798_v31 = vmul.f32 %v1877_v28, %v797_v30  ;;  %v795_v32 = vsel %vm794_vm9, %v1875_v22, %v791_v29 }
 0x936   :  { %v806_v37 = vmul.f32 %v795_v32, %v772_v5 }
 0x937   :  { %v799_v34 = vmul.f32 0.5, %v798_v31 }
 0x938   :  { %v811_v42 = vmul.f32 %v1831_v36, %v806_v37 }
 0x939   :  { %v800_v35 = vsub.f32 1.5, %v799_v34 }
 0x93a   :  { %v2252_v46 = vadd.f32 %v1832_v41, %v811_v42 }
 0x93b   :  { %v801_v39 = vmul.f32 %v1877_v28, %v800_v35 }
 0x93d   :  { %v805_v40 = vsel %vm804_vm12, %v1877_v28, %v801_v39  ;;  %vm1422_vm12 = vcmask 31744  }
 0x93e   :  { %v807_v44 = vmul.f32 %v805_v40, %v773_v10 }
 0x940   :  { %v812_v45 = vmul.f32 %v1831_v36, %v807_v44 }
 0x942   :  { %v2254_v47 = vadd.f32 %v1832_v41, %v812_v45 }
 0x944   :  { %v818_v48 = vpack.c.bf16 %v2254_v47, %v2252_v46 }
 0x946   :  { %1652 = vmatmul.msk.bf16.vlgmr.msra.gmra.mxu0 %vm228_vm5, %v818_v48 }
 0x9c3   :  { %v853_v50 = vpop.f32.mrf.mxu0 }
 0x9c4   :  { %v854_v51 = vadd.f32 %v1833_v49, %v853_v50 }
 0x9c6   :  { %866 = vrot.lane.b32.xlu1 %v854_v51, %s1970_s0 }
 0x9cb   :  { %v855_v52 = vpop.f32.mrf.mxu0 }
 0x9cc   :  { %v856_v53 = vadd.f32 %v1833_v49, %v855_v52 }
 0x9ce   :  { %997 = vrot.lane.b32.xlu0 %v856_v53, %s1971_s5  ;;  %868 = vrot.lane.b32.xlu2 %v856_v53, %s1970_s0  ;;  %v1812_v10 = vpack.i.bf16 %v854_v51, %v856_v53 }
 0x9cf   :  { %993 = vrot.lane.b32.xlu1 %v856_v53, %s1972_s17 }
 0x9d6   :  { %991 = vrot.lane.b32.xlu0 %v854_v51, %s1972_s17  ;;  %995 = vrot.lane.b32.xlu2 %v854_v51, %s1971_s5 }
 0xa28   :  { %v869_v54 = vpop.permute.xlu2 %868 }
 0xa29   :  { %1654 = vmatpush.xpose.msk.msrb.mxu0 %vm341_vm13, %v869_v54  ;;  %1761 = vmatpush.xpose.msk.msrb.mxu2 %vm341_vm13, %v869_v54  ;;  %v1752_v54 = vld [vmem:[%s2044_s30 + $0x18] sm:$0xff] }
 0xa30   :  { %v996_v56 = vpop.permute.xlu2 %995 }
 0xa38   :  { %v867_v55 = vpop.permute.xlu1 %866 }
 0xa39   :  { %1655 = vmatpush.xpose.msk.msrb.mxu0 %vm341_vm13, %v867_v55  ;;  %1762 = vmatpush.xpose.msk.msrb.mxu2 %vm341_vm13, %v867_v55  ;;  %v1751_v55 = vld [vmem:[%s2044_s30 + $0x10] sm:$0xff]  ;;  %s2382_s30 = sld [smem:[#allocation15_spill]] }
 0xa3a   :  { %982 = vmatpush.bf16.msrb.mxu1 %v1751_v55  ;;  %v1756_v55 = vld [vmem:[%s2375_s3 + $0x28] sm:$0xff] }
 0xa3c   :  { %1656 = vmatmul.msk.f32.vlgmr.msrb.gmra.mxu0 %vm341_vm13, %v854_v51  ;;  %1657 = vmatmul.msk.f32.vlgmr.msrb.gmra.mxu2 %vm341_vm13, %v856_v53 }
 0xa40   :  { %v998_v18 = vpop.permute.xlu0 %997 }
 0xa41   :  { %1667 = vmatpush.xpose.msk.msra.mxu0 %vm341_vm13, %v998_v18  ;;  %v994_v58 = vpop.permute.xlu1 %993 }
 0xa45   :  { %1668 = vmatpush.xpose.msk.msra.mxu0 %vm341_vm13, %v996_v56 }
 0xa48   :  { %v992_v57 = vpop.permute.xlu0 %991 }
 0xa49   :  { %1669 = vmatmul.msk.f32.vlgmr.msra.gmra.mxu0 %vm341_vm13, %v992_v57 }
 0xa51   :  { %1670 = vmatmul.msk.f32.gmra.mxu0 %vm341_vm13, %v994_v58 }
 0xab9   :  { %v895_v59 = vpop.f32.mrf.mxu0 }
 0xaba   :  { %v901_v60 = vmul.f32 0.25, %v895_v59 }
 0xabc   :  { %v903_v19 = vadd.f32 %v901_v60, %v2190_v33 }
 0xabe   :  { %v905_v61 = vsel %vm341_vm13, %v903_v19, -inf }
 0xabf   :  { %906 = vmax.xlane.f32.xlu0 %v905_v61  ;;  %v898_v0 = vpop.f32.mrf.mxu2 }
 0xac0   :  { %v902_v2 = vmul.f32 0.25, %v898_v0 }
 0xac2   :  { %v904_v6 = vadd.f32 %v902_v2, %v2195_v38 }
 0xac4   :  { %v908_v8 = vsel %vm341_vm13, %v904_v6, -inf }
 0xac6   :  { %v1024_v62 = vpop.f32.mrf.mxu0 }
 0xac7   :  { %v1030_v63 = vmul.f32 0.25, %v1024_v62 }
 0xac9   :  { %v1032_v1 = vadd.f32 %v1030_v63, %v2190_v33 }
 0xacb   :  { %v1034_v3 = vsel %vm341_vm13, %v1032_v1, -inf }
 0xacc   :  { %1035 = vmax.xlane.f32.xlu2 %v1034_v3 }
 0xace   :  { %v1027_v4 = vpop.f32.mrf.mxu0 }
 0xacf   :  { %v1031_v5 = vmul.f32 0.25, %v1027_v4 }
 0xad1   :  { %v1033_v7 = vadd.f32 %v1031_v5, %v2195_v38 }
 0xad3   :  { %v1037_v9 = vsel %vm341_vm13, %v1033_v7, -inf }
 0xad4   :  { %909 = vmax.xlane.f32.xlu2 %v908_v8  ;;  %1038 = vmax.xlane.f32.xlu1 %v1037_v9 }
 0xaec   :  { %1813 = vrot.lane.b32.xlu2 %v1812_v10, %s1974_s25 }
 0xb32   :  { %v907_v33 = vpop.xlane.xlu0 %906 }
 0xb33   :  { %v911_v11 = vsub.f32 %v903_v19, %v907_v33  ;;  %v1834_v19 = vld [vmem:[%s2049_s6 + $0x1] ss:$0 sm:$0xff]  ;;  %s2383_s6 = sld [smem:[#allocation16_spill]] }
 0xb35   :  { %v913_v12 = vmul.f32 1.442695, %v911_v11 }
 0xb37   :  { %1878 = vpow2.f32 %v913_v12 }
 0xb3d   :  { %v1879_v13 = vpop.eup %1878 }
 0xb3e   :  { %v917_v14 = vsel %vm341_vm13, %v1879_v13, 0.0 }
 0xb3f   :  { %v1036_v15 = vpop.xlane.xlu2 %1035  ;;  %918 = vadd.xlane.f32.xlu1 %v917_v14 }
 0xb40   :  { %v1040_v16 = vsub.f32 %v1032_v1, %v1036_v15 }
 0xb42   :  { %v1042_v38 = vmul.f32 1.442695, %v1040_v16 }
 0xb44   :  { %1880 = vpow2.f32 %v1042_v38 }
 0xb47   :  { %v910_v17 = vpop.xlane.xlu2 %909  ;;  %v1039_v20 = vpop.xlane.xlu1 %1038 }
 0xb48   :  { %v1041_v21 = vsub.f32 %v1033_v7, %v1039_v20  ;;  %v912_v24 = vsub.f32 %v904_v6, %v910_v17  ;;  %v1753_v20 = vld [vmem:[%s2064_s27 + $0x10] sm:$0xff] }
 0xb4a   :  { %v1881_v22 = vpop.eup %1880  ;;  %v1044_v23 = vmul.f32 1.442695, %v1041_v21  ;;  %v915_v26 = vmul.f32 1.442695, %v912_v24 }
 0xb4b   :  { %v1046_v25 = vsel %vm341_vm13, %v1881_v22, 0.0 }
 0xb4c   :  { %1047 = vadd.xlane.f32.xlu0 %v1046_v25  ;;  %1882 = vpow2.f32 %v1044_v23 }
 0xb4d   :  { %1884 = vpow2.f32 %v915_v26 }
 0xb4f   :  { %v1814_v27 = vpop.permute.xlu2 %1813 }
 0xb50   :  { %v1815_v28 = vunpack.i.l.bf16 %v1814_v27  ;;  %v1816_v29 = vunpack.i.h.bf16 %v1814_v27 }
 0xb52   :  { %1082 = vmatpush.msra.mxu2 %v1815_v28  ;;  %v1883_v30 = vpop.eup %1882 }
 0xb53   :  { %v1049_v31 = vsel %vm341_vm13, %v1883_v30, 0.0  ;;  %v1885_v32 = vpop.eup %1884 }
 0xb54   :  { %1083 = vmatpush.msra.mxu2 %v1816_v29  ;;  %1050 = vadd.xlane.f32.xlu0 %v1049_v31  ;;  %v920_v34 = vsel %vm341_vm13, %v1885_v32, 0.0 }
 0xb58   :  { %1818 = vrot.lane.b32.xlu1 %v1812_v10, %s1973_s9 }
 0xb5c   :  { %921 = vadd.xlane.f32.xlu0 %v920_v34 }
 0xbb2   :  { %v919_v36 = vpop.xlane.xlu1 %918 }
 0xbbf   :  { %v1048_v35 = vpop.xlane.xlu0 %1047 }
 0xbc0   :  { %1886 = vrcp.f32 %v1048_v35 }
 0xbc1   :  { %1888 = vrcp.f32 %v919_v36 }
 0xbc6   :  { %v1887_v37 = vpop.eup %1886 }
 0xbc7   :  { %v1054_v39 = vmul.f32 %v1887_v37, %v1881_v22  ;;  %v1051_v40 = vpop.xlane.xlu0 %1050  ;;  %v1889_v42 = vpop.eup %1888 }
 0xbc8   :  { %1890 = vrcp.f32 %v1051_v40  ;;  %v925_v48 = vmul.f32 %v1889_v42, %v1879_v13 }
 0xbc9   :  { %1671 = vmatmul.msk.f32.vlgmr.msra.gmra.mxu2 %vm341_vm13, %v1054_v39  ;;  %v1835_v39 = vld [vmem:[%s2054_s12 + $0x1] ss:$0 sm:$0xff]  ;;  %s2384_s12 = sld [smem:[#allocation5_spill]] }
 0xbca   :  { %v1819_v41 = vpop.permute.xlu1 %1818 }
 0xbcb   :  { %v1820_v44 = vunpack.i.l.bf16 %v1819_v41  ;;  %v1821_v45 = vunpack.i.h.bf16 %v1819_v41 }
 0xbcd   :  { %953 = vmatpush.msrb.mxu3 %v1820_v44  ;;  %v1836_v44 = vld [vmem:[%s2374_s29 + $0x1] ss:$0 sm:$0xff] }
 0xbce   :  { %v1891_v49 = vpop.eup %1890 }
 0xbcf   :  { %954 = vmatpush.msrb.mxu3 %v1821_v45  ;;  %v922_v50 = vpop.xlane.xlu0 %921  ;;  %v1055_v51 = vmul.f32 %v1891_v49, %v1883_v30 }
 0xbd0   :  { %1658 = vmatmul.msk.f32.vlgmr.msrb.gmra.mxu3 %vm341_vm13, %v925_v48  ;;  %1892 = vrcp.f32 %v922_v50 }
 0xbd1   :  { %1672 = vmatmul.msk.f32.gmra.mxu2 %vm341_vm13, %v1055_v51  ;;  %1111 = vmatpush.bf16.msra.mxu3 %v1752_v54  ;;  %v1757_v54 = vld [vmem:[%s2375_s3 + $0x30] sm:$0xff] }
 0xbd6   :  { %v1893_v52 = vpop.eup %1892 }
 0xbd7   :  { %v926_v53 = vmul.f32 %v1893_v52, %v1885_v32 }
 0xbd9   :  { %1659 = vmatmul.msk.f32.gmra.mxu3 %vm341_vm13, %v926_v53  ;;  %v1758_v53 = vld [vmem:[%s2375_s3 + $0x38] sm:$0xff] }
 0xbda   :  { %1284 = vmatpush.bf16.msrb.mxu0 %v1758_v53 }
 0xbde   :  { %1285 = vmatpush.bf16.msrb.mxu0 %v1757_v54 }
 0xbe2   :  { %1286 = vmatpush.bf16.msrb.mxu0 %v1756_v55 }
 0xc4c   :  { %v1085_v18 = vpop.f32.mrf.mxu2 }
 0xc53   :  { %v956_v56 = vpop.f32.mrf.mxu3 }
 0xc54   :  { %v1088_v57 = vpop.f32.mrf.mxu2 }
 0xc55   :  { %v1091_v58 = vpack.c.bf16 %v1088_v57, %v1085_v18  ;;  %v1837_v18 = vld [vmem:[%s2376_s8 + $0x1] ss:$0 sm:$0xff] }
 0xc57   :  { %1679 = vmatmul.msk.bf16.vlgmr.msra.gmra.mxu3 %vm341_vm13, %v1091_v58 }
 0xc5c   :  { %v959_v59 = vpop.f32.mrf.mxu3 }
 0xc5d   :  { %v962_v60 = vpack.c.bf16 %v959_v59, %v956_v56  ;;  %v1755_v56 = vld [vmem:[%s2375_s3 + $0x20] sm:$0xff] }
 0xc5e   :  { %1287 = vmatpush.bf16.msrb.mxu0 %v1755_v56 }
 0xc5f   :  { %1666 = vmatmul.msk.bf16.vlgmr.msrb.gmra.mxu1 %vm341_vm13, %v962_v60 }
 0xcda   :  { %v1113_v61 = vpop.f32.mrf.mxu3 }
 0xcdc   :  { %v984_v62 = vpop.f32.mrf.mxu1 }
 0xcdd   :  { %v989_v63 = vadd.f32 %v1834_v19, %v984_v62 }
 0xcdf   :  { %v1118_v0 = vadd.f32 %v1113_v61, %v989_v63 }
 0xce1   :  { %v1120_v1 = vadd.f32 %v1118_v0, %v2252_v46 }
 0xce2   :  { %v1115_v5 = vpop.f32.mrf.mxu3 }
 0xce3   :  { %v1126_v2 = vsel %vm228_vm5, %v1120_v1, 0.0 }
 0xce4   :  { %1127 = vadd.xlane.f32.xlu0 %v1126_v2  ;;  %v986_v3 = vpop.f32.mrf.mxu1 }
 0xce5   :  { %v990_v4 = vadd.f32 %v1834_v19, %v986_v3 }
 0xce7   :  { %v1119_v6 = vadd.f32 %v1115_v5, %v990_v4 }
 0xce9   :  { %v1121_v7 = vadd.f32 %v1119_v6, %v2254_v47  ;;  %v1754_v47 = vld [vmem:[%s2064_s27 + $0x18] sm:$0xff]  ;;  %s2385_s27 = sld [smem:[#allocation14_spill]] }
 0xcea   :  { %1212 = vmatpush.bf16.msra.mxu1 %v1754_v47 }
 0xceb   :  { %v1129_v8 = vsel %vm228_vm5, %v1121_v7, 0.0 }
 0xcec   :  { %1130 = vadd.xlane.f32.xlu2 %v1129_v8 }
 0xcee   :  { %1213 = vmatpush.bf16.msra.mxu1 %v1753_v20 }
 0xd57   :  { %v1128_v9 = vpop.xlane.xlu0 %1127 }
 0xd58   :  { %v1132_v10 = vmul.f32 %v1128_v9, %v2155_v43 }
 0xd5a   :  { %v1134_v33 = vsub.f32 %v1120_v1, %v1132_v10 }
 0xd5c   :  { %v1136_v11 = vmul.f32 %v1134_v33, %v1134_v33 }
 0xd5e   :  { %v1138_v46 = vsel %vm228_vm5, %v1136_v11, 0.0 }
 0xd5f   :  { %1139 = vadd.xlane.f32.xlu0 %v1138_v46  ;;  %v1131_v12 = vpop.xlane.xlu2 %1130 }
 0xd60   :  { %v1133_v13 = vmul.f32 %v1131_v12, %v2155_v43 }
 0xd62   :  { %v1135_v14 = vsub.f32 %v1121_v7, %v1133_v13 }
 0xd64   :  { %v1137_v15 = vmul.f32 %v1135_v14, %v1135_v14 }
 0xd66   :  { %v1141_v16 = vsel %vm228_vm5, %v1137_v15, 0.0 }
 0xd67   :  { %1142 = vadd.xlane.f32.xlu1 %v1141_v16 }
 0xdd2   :  { %v1140_v38 = vpop.xlane.xlu0 %1139 }
 0xdd3   :  { %v1144_v17 = vmul.f32 %v1140_v38, %v2155_v43 }
 0xdd5   :  { %v1146_v21 = vadd.f32 1e-12, %v1144_v17 }
 0xdd7   :  { %1894 = vrsqrt.f32 %v1146_v21  ;;  %vm1154_vm15 = vweird.f32 %v1146_v21 }
 0xdda   :  { %v1143_v22 = vpop.xlane.xlu1 %1142 }
 0xddb   :  { %v1145_v23 = vmul.f32 %v1143_v22, %v2155_v43 }
 0xddd   :  { %v1895_v24 = vpop.eup %1894  ;;  %v1147_v25 = vadd.f32 1e-12, %v1145_v23 }
 0xdde   :  { %v1149_v26 = vmul.f32 %v1895_v24, %v1146_v21  ;;  %vm1155_vm14 = vweird.f32 %v1895_v24 }
 0xddf   :  { %1896 = vrsqrt.f32 %v1147_v25  ;;  %vm1156_vm1 = vmor %vm1154_vm15, %vm1155_vm14  ;;  %vm1164_vm3 = vweird.f32 %v1147_v25 }
 0xde0   :  { %v1150_v27 = vmul.f32 %v1895_v24, %v1149_v26 }
 0xde2   :  { %v1151_v28 = vmul.f32 0.5, %v1150_v27 }
 0xde4   :  { %v1152_v29 = vsub.f32 1.5, %v1151_v28 }
 0xde5   :  { %v1897_v30 = vpop.eup %1896 }
 0xde6   :  { %v1153_v31 = vmul.f32 %v1895_v24, %v1152_v29  ;;  %v1159_v32 = vmul.f32 %v1897_v30, %v1147_v25  ;;  %vm1165_vm2 = vweird.f32 %v1897_v30 }
 0xde7   :  { %vm1166_vm4 = vmor %vm1164_vm3, %vm1165_vm2 }
 0xde8   :  { %v1160_v34 = vmul.f32 %v1897_v30, %v1159_v32  ;;  %v1157_v35 = vsel %vm1156_vm1, %v1895_v24, %v1153_v31  ;;  %vm1526_vm1 = vcmask 123904  }
 0xde9   :  { %v1168_v40 = vmul.f32 %v1157_v35, %v1134_v33 }
 0xdea   :  { %v1161_v36 = vmul.f32 0.5, %v1160_v34 }
 0xdeb   :  { %v1173_v45 = vmul.f32 %v1835_v39, %v1168_v40 }
 0xdec   :  { %v1162_v37 = vsub.f32 1.5, %v1161_v36  ;;  %v1760_v36 = vld [vmem:[%s2380_s19 + $0x8] sm:$0xff] }
 0xded   :  { %v1178_v50 = vadd.f32 %v1836_v44, %v1173_v45  ;;  %1408 = vmatpush.bf16.msrb.mxu3 %v1760_v36 }
 0xdee   :  { %v1163_v41 = vmul.f32 %v1897_v30, %v1162_v37 }
 0xdf0   :  { %v1167_v42 = vsel %vm1166_vm4, %v1897_v30, %v1163_v41 }
 0xdf1   :  { %v1169_v48 = vmul.f32 %v1167_v42, %v1135_v14  ;;  %v1838_v14 = vld [vmem:[%s2377_s14 + $0x1] ss:$0 sm:$0xff] }
 0xdf3   :  { %v1174_v49 = vmul.f32 %v1835_v39, %v1169_v48 }
 0xdf5   :  { %v1179_v51 = vadd.f32 %v1836_v44, %v1174_v49 }
 0xdf7   :  { %v1180_v52 = vpack.c.bf16 %v1179_v51, %v1178_v50 }
 0xdf9   :  { %1695 = vmatmul.msk.bf16.vlgmr.msra.gmra.mxu1 %vm228_vm5, %v1180_v52  ;;  %v1839_v52 = vld [vmem:[%s2378_s7 + $0x1] ss:$0 sm:$0xff] }
 0xe76   :  { %v1215_v57 = vpop.f32.mrf.mxu1 }
 0xe77   :  { %v1216_v58 = vadd.f32 %v1837_v18, %v1215_v57 }
 0xe79   :  { %v1220_v59 = vmul.f32 %v1216_v58, %v1216_v58 }
 0xe7b   :  { %v1222_v60 = vmul.f32 %v1220_v59, %v1216_v58 }
 0xe7d   :  { %v1224_v19 = vmul.f32 0.044715, %v1222_v60 }
 0xe7e   :  { %v1217_v61 = vpop.f32.mrf.mxu1 }
 0xe7f   :  { %v1226_v62 = vadd.f32 %v1224_v19, %v1216_v58  ;;  %v1218_v63 = vadd.f32 %v1837_v18, %v1217_v61 }
 0xe81   :  { %v1228_v0 = vmul.f32 0.7978846, %v1226_v62  ;;  %v1221_v1 = vmul.f32 %v1218_v63, %v1218_v63 }
 0xe83   :  { %v1223_v2 = vmul.f32 %v1221_v1, %v1218_v63  ;;  %1898 = vtanh.f32 %v1228_v0  ;;  %v1759_v0 = vld [vmem:[%s2380_s19] sm:$0xff] }
 0xe84   :  { %1409 = vmatpush.bf16.msrb.mxu3 %v1759_v0 }
 0xe85   :  { %v1225_v3 = vmul.f32 0.044715, %v1223_v2 }
 0xe87   :  { %v1227_v4 = vadd.f32 %v1225_v3, %v1218_v63  ;;  %v1420_v3 = vld [vmem:[%s2382_s30 + $0x18] sm:$0xff] }
 0xe89   :  { %v1229_v5 = vmul.f32 0.7978846, %v1227_v4  ;;  %v1899_v6 = vpop.eup %1898  ;;  %v1419_v4 = vld [vmem:[%s2382_s30 + $0x10] sm:$0xff] }
 0xe8a   :  { %v1232_v7 = vadd.f32 1.0, %v1899_v6  ;;  %v1417_v6 = vld [vmem:[%s2382_s30] sm:$0xff] }
 0xe8b   :  { %1900 = vtanh.f32 %v1229_v5  ;;  %v1418_v5 = vld [vmem:[%s2382_s30 + $0x8] sm:$0xff] }
 0xe8c   :  { %v1234_v9 = vmul.f32 0.5, %v1232_v7  ;;  %v1421_v7 = vld [vmem:[%s2383_s6] sm:$0xf] }
 0xe8d   :  { %1734 = vmatpush.msk.msrb.mxu1 %vm193_vm0, %v1421_v7 }
 0xe8e   :  { %v1236_v11 = vmul.f32 %v1234_v9, %v1216_v58  ;;  %v1841_v9 = vld [vmem:[%s2385_s27] ss:$0 sm:$0xff] }
 0xe91   :  { %v1901_v8 = vpop.eup %1900 }
 0xe92   :  { %v1233_v10 = vadd.f32 1.0, %v1901_v8  ;;  %v1416_v8 = vld [vmem:[%s2384_s12] sm:$0x3] }
 0xe93   :  { %1735 = vmatmul.msk.f32.vlgmr.msrb.gmra.mxu1 %vm1422_vm12, %v1416_v8 }
 0xe94   :  { %v1235_v33 = vmul.f32 0.5, %v1233_v10 }
 0xe96   :  { %v1237_v46 = vmul.f32 %v1235_v33, %v1218_v63  ;;  %v1354_v63 = vld [vmem:[%s2381_s24] sm:$0x3] }
 0xe98   :  { %v1238_v12 = vpack.c.bf16 %v1237_v46, %v1236_v11 }
 0xe9a   :  { %1721 = vmatmul.msk.bf16.vlgmr.msrb.gmra.mxu0 %vm742_vm6, %v1238_v12 }
 0xf10   :  { %v1446_v12 = vpop.f32.mrf.mxu1 }
 0xf17   :  { %v1289_v13 = vpop.f32.mrf.mxu0 }
 0xf18   :  { %v1290_v38 = vadd.f32 %v1838_v14, %v1289_v13  ;;  %v1842_v13 = vld [vmem:[%s2114_s13] ss:$0 sm:$0xff]  ;;  %s1975_s13 = smov [#allocation2]  }
 0xf1a   :  { %v1294_v20 = vadd.f32 %v1290_v38, %v1178_v50 }
 0xf1c   :  { %v1300_v21 = vsel %vm228_vm5, %v1294_v20, 0.0 }
 0xf1f   :  { %v1291_v15 = vpop.f32.mrf.mxu0 }
 0xf20   :  { %v1292_v16 = vadd.f32 %v1838_v14, %v1291_v15  ;;  %v1498_v14 = vld [vmem:[%s2119_s21 + $0x8] sm:$0xff] }
 0xf21   :  { %1520 = vmatpush.msra.mxu0 %v1498_v14 }
 0xf22   :  { %v1295_v47 = vadd.f32 %v1292_v16, %v1179_v51 }
 0xf24   :  { %v1303_v17 = vsel %vm228_vm5, %v1295_v47, 0.0 }
 0xf25   :  { %1304 = vadd.xlane.f32.xlu0 %v1303_v17 }
 0xf2d   :  { %1301 = vadd.xlane.f32.xlu0 %v1300_v21 }
 0xf98   :  { %v1305_v22 = vpop.xlane.xlu0 %1304 }
 0xf99   :  { %v1307_v23 = vmul.f32 %v1305_v22, %v2155_v43 }
 0xf9b   :  { %v1309_v24 = vsub.f32 %v1295_v47, %v1307_v23  ;;  %v1497_v47 = vld [vmem:[%s2119_s21] sm:$0xff]  ;;  %s1533_s21 = sshll.u32 %s1975_s13, 4  ;;  %s1534_s21 = int_to_ptr.vmem [resolvable:$true] %s1533_s21 }
 0xf9c   :  { %1521 = vmatpush.msra.mxu0 %v1497_v47 }
 0xf9d   :  { %v1311_v25 = vmul.f32 %v1309_v24, %v1309_v24 }
 0xf9f   :  { %v1315_v26 = vsel %vm228_vm5, %v1311_v25, 0.0 }
 0xfa0   :  { %1316 = vadd.xlane.f32.xlu0 %v1315_v26  ;;  %v1302_v27 = vpop.xlane.xlu0 %1301 }
 0xfa1   :  { %v1306_v28 = vmul.f32 %v1302_v27, %v2155_v43 }
 0xfa3   :  { %v1308_v29 = vsub.f32 %v1294_v20, %v1306_v28 }
 0xfa5   :  { %v1310_v30 = vmul.f32 %v1308_v29, %v1308_v29 }
 0xfa7   :  { %v1312_v31 = vsel %vm228_vm5, %v1310_v30, 0.0 }
 0xfa8   :  { %1313 = vadd.xlane.f32.xlu0 %v1312_v31 }
0x1013   :  { %v1317_v32 = vpop.xlane.xlu0 %1316 }
0x1014   :  { %v1319_v34 = vmul.f32 %v1317_v32, %v2155_v43 }
0x1016   :  { %v1321_v35 = vadd.f32 1e-12, %v1319_v34  ;;  %v1843_v34 = vld [vmem:[%s2124_s20] ss:$0 sm:$0xff] }
0x1018   :  { %1902 = vrsqrt.f32 %v1321_v35  ;;  %vm1338_vm7 = vweird.f32 %v1321_v35 }
0x101b   :  { %v1314_v37 = vpop.xlane.xlu0 %1313 }
0x101c   :  { %v1318_v39 = vmul.f32 %v1314_v37, %v2155_v43  ;;  %v1840_v43 = vld [vmem:[%s2379_s10 + $0x1] ss:$0 sm:$0xff] }
0x101e   :  { %v1903_v40 = vpop.eup %1902  ;;  %v1320_v41 = vadd.f32 1e-12, %v1318_v39 }
0x101f   :  { %v1333_v42 = vmul.f32 %v1903_v40, %v1321_v35  ;;  %vm1339_vm6 = vweird.f32 %v1903_v40 }
0x1020   :  { %1904 = vrsqrt.f32 %v1320_v41  ;;  %vm1340_vm8 = vmor %vm1338_vm7, %vm1339_vm6  ;;  %vm1328_vm10 = vweird.f32 %v1320_v41 }
0x1021   :  { %v1334_v44 = vmul.f32 %v1903_v40, %v1333_v42 }
0x1023   :  { %v1335_v45 = vmul.f32 0.5, %v1334_v44 }
0x1025   :  { %v1336_v48 = vsub.f32 1.5, %v1335_v45 }
0x1026   :  { %v1905_v49 = vpop.eup %1904 }
0x1027   :  { %v1337_v50 = vmul.f32 %v1903_v40, %v1336_v48  ;;  %v1323_v51 = vmul.f32 %v1905_v49, %v1320_v41  ;;  %vm1329_vm9 = vweird.f32 %v1905_v49 }
0x1028   :  { %vm1330_vm11 = vmor %vm1328_vm10, %vm1329_vm9 }
0x1029   :  { %v1341_v53 = vsel %vm1340_vm8, %v1903_v40, %v1337_v50  ;;  %v1324_v54 = vmul.f32 %v1905_v49, %v1323_v51 }
0x102a   :  { %v1343_v55 = vmul.f32 %v1341_v53, %v1309_v24 }
0x102b   :  { %v1325_v18 = vmul.f32 0.5, %v1324_v54 }
0x102c   :  { %v1348_v56 = vmul.f32 %v1839_v52, %v1343_v55 }
0x102d   :  { %v1326_v57 = vsub.f32 1.5, %v1325_v18 }
0x102e   :  { %v1353_v58 = vadd.f32 %v1840_v43, %v1348_v56 }
0x102f   :  { %v1327_v59 = vmul.f32 %v1905_v49, %v1326_v57 }
0x1030   :  { %1372 = vmatpush.msrb.mxu2 %v1353_v58 }
0x1031   :  { %v1331_v60 = vsel %vm1330_vm11, %v1905_v49, %v1327_v59 }
0x1032   :  { %v1342_v19 = vmul.f32 %v1331_v60, %v1308_v29 }
0x1034   :  { %v1347_v61 = vmul.f32 %v1839_v52, %v1342_v19 }
0x1036   :  { %v1352_v62 = vadd.f32 %v1840_v43, %v1347_v61 }
0x1038   :  { %1373 = vmatpush.msrb.mxu2 %v1352_v62 }
0x1039   :  { %1724 = vmatmul.msk.f32.vlgmr.msrb.gmra.mxu2 %vm341_vm13, %v1354_v63 }
0x103a   :  { %1464 = vmatpush.msra.mxu2 %v1420_v3 }
0x103c   :  { %1465 = vmatpush.msra.mxu2 %v1419_v4 }
0x103e   :  { %1466 = vmatpush.msra.mxu2 %v1418_v5 }
0x1040   :  { %1467 = vmatpush.msra.mxu2 %v1417_v6 }
0x10bc   :  { %v1375_v1 = vpop.f32.mrf.mxu2 }
0x10bd   :  { %v1378_v2 = vpack.c.bf16 %v1375_v1, %v1375_v1 }
0x10bf   :  { %1733 = vmatmul.msk.bf16.vlgmr.msrb.gmra.mxu3 %vm228_vm5, %v1378_v2 }
0x1142   :  { %v1411_v10 = vpop.f32.mrf.mxu3 }
0x1143   :  { %v1412_v33 = vadd.f32 %v1841_v9, %v1411_v10 }
0x1145   :  { %1906 = vtanh.f32 %v1412_v33 }
0x114a   :  { %v1413_v11 = vpop.f32.mrf.mxu3 }
0x114b   :  { %v1907_v46 = vpop.eup %1906 }
0x114c   :  { %1736 = vmatmul.msk.f32.vlgmr.msra.gmra.mxu2 %vm228_vm5, %v1907_v46 }
0x11cf   :  { %v1469_v15 = vpop.f32.mrf.mxu2 }
0x11d0   :  { %v1470_v16 = vadd.f32 %v1469_v15, %v1446_v12 }
0x11d2   :  { %v1476_v38 = vadd.f32 %v1842_v13, %v1470_v16 }
0x11d4   :  { %v1737_v17 = vmul.f32 -1.442695, %v1476_v38 }
0x11d6   :  { %1908 = vpow2.f32 %v1737_v17 }
0x11dc   :  { %v1909_v20 = vpop.eup %1908 }
0x11dd   :  { %v1480_v21 = vadd.f32 1.0, %v1909_v20 }
0x11df   :  { %1910 = vrcp.f32 %v1480_v21  ;;  %v1492_v25 = vand.u32 2147483648, %v1480_v21  ;;  %v1490_v27 = vand.u32 2147483647, %v1480_v21  ;;  %vm1486_vm5 = vweird.f32 %v1480_v21 }
0x11e1   :  { %v1493_v29 = vor.u32 1.1754944e-38, %v1492_v25  ;;  %vm1491_vm15 = vcmp.eq.f32.partialorder %v1490_v27, 8.507059e+37 }
0x11e5   :  { %v1911_v22 = vpop.eup %1910 }
0x11e6   :  { %v1482_v23 = vmul.f32 %v1911_v22, %v1480_v21  ;;  %vm1487_vm0 = vweird.f32 %v1911_v22 }
0x11e7   :  { %vm1488_vm14 = vmor %vm1486_vm5, %vm1487_vm0 }
0x11e8   :  { %v1483_v24 = vsub.f32 1.0, %v1482_v23 }
0x11ea   :  { %v1484_v26 = vmul.f32 %v1911_v22, %v1483_v24 }
0x11ec   :  { %v1485_v28 = vadd.f32 %v1911_v22, %v1484_v26 }
0x11ee   :  { %v1489_v30 = vsel %vm1488_vm14, %v1911_v22, %v1485_v28 }
0x11ef   :  { %v1494_v31 = vsel %vm1491_vm15, %v1493_v29, %v1489_v30 }
0x11f0   :  { %v1496_v32 = vmul.f32 %v1494_v31, %v1476_v38 }
0x11f2   :  { %1738 = vmatmul.msk.f32.vlgmr.msra.gmra.mxu0 %vm341_vm13, %v1496_v32 }
0x126f   :  { %v1523_v35 = vpop.f32.mrf.mxu0 }
0x1270   :  { %v1524_v36 = vadd.f32 %v1843_v34, %v1523_v35 }
0x1272   :  { %1527 = vst.msk [vmem:[#allocation2] sm:$0x3] %vm1526_vm1, %v1524_v36 }
0x1273   :  { %1935 = shalt.err (!%p1932_p4)
}
0x1274   :  { %1538 = dma.vmem_to_hbm [thread:$0]  %s1534_s21, 32, %s1536_s11, [#allocation3]  }
0x1275   :  { %1936 = dma.done.wait [#allocation3], 32  }
0x1276   :  { %1937 = vsyncadd [#allocation3], 4294967264 }
0x1277   :  { %1543 = vsyncpa [#allocation3], 1 }

</bundles_post_ra>
